<compile_context>
chip_gen: v5e
topology: v5e:2x2
jax: 0.10.0
libtpu: 0.0.40
codegen_flags: <defaults>
</compile_context>

<pallas_src>
import functools

import numpy as np
import jax
import jax.numpy as jnp
from jax.experimental import pallas as pl
from jax.experimental.pallas import tpu as pltpu

F32_MIN = float(np.finfo(np.float32).min)


def _round_up(x, m):
    return (x + m - 1) // m * m


def _vmem_capacity_bytes():
    try:
        info = pltpu.get_tpu_info()
        cap = getattr(info, "vmem_capacity_bytes", None)
        if cap:
            return int(cap)
    except Exception:
        pass
    return 64 * 1024 * 1024  # conservative (v7x per-TC) fallback


def _tdc_kernel(n, tr, tc, col_resident,
                emb_row_ref, emb_colT_ref, lab_a_ref, lab_o_ref,
                loss_ref, negcnt_ref,
                m_scr, s_scr, lse_scr):
    i = pl.program_id(0)          # anchor-row block
    p = pl.program_id(1)          # 0: negative-LSE pass, 1: positive-loss pass
    j = pl.program_id(2)          # column block
    ncols = pl.num_programs(2)

    # ---- logits tile: rows are pre-normalized * (1/temperature), columns are ----
    # ---- pre-normalized and pre-transposed to (D, Npad) -> lane-dense, no    ----
    # ---- per-tile XLU transpose.                                             ----
    er = emb_row_ref[...]                                        # (TR, D)
    if col_resident:
        col_start = pl.multiple_of(j * tc, tc)
        ec = emb_colT_ref[:, pl.ds(col_start, tc)]               # (D, TC) slice of resident matrix
    else:
        ec = emb_colT_ref[...]                                   # (D, TC) streamed tile
    logits = jnp.dot(er, ec, preferred_element_type=jnp.float32)  # (TR, TC) f32, already / temperature

    # ---- pairwise label distance (labels pre-scaled by 1/tol_dist) & masks ----
    lab_a = lab_a_ref[...]                                       # (TR, 1)
    lab_o = lab_o_ref[...]                                       # (1, TC)
    diff = jnp.abs(lab_a - lab_o)                                # (TR, TC)
    lt = diff < 1.0                                              # one compare feeds both passes

    row_g = i * tr + jax.lax.broadcasted_iota(jnp.int32, (tr, 1), 0)   # (TR,1)
    col_g = j * tc + jax.lax.broadcasted_iota(jnp.int32, (1, tc), 1)   # (1,TC)
    in_bounds = jnp.maximum(row_g, col_g) < n                    # (TR, TC)

    # ---- pass 0: online LSE over each anchor's negatives + per-anchor count ----
    @pl.when(p == 0)
    def _():
        @pl.when(j == 0)
        def _():
            m_scr[...] = jnp.full_like(m_scr, F32_MIN)
            s_scr[...] = jnp.zeros_like(s_scr)
            negcnt_ref[...] = jnp.zeros_like(negcnt_ref)

        neg_mask = jnp.logical_and(jnp.logical_not(lt), in_bounds)
        neg_logits = jnp.where(neg_mask, logits, F32_MIN)
        m_new = jnp.maximum(m_scr[...], jnp.max(neg_logits, axis=1, keepdims=True))
        contrib = jnp.where(neg_mask, jnp.exp(jnp.minimum(logits - m_new, 0.0)), 0.0)
        s_scr[...] = (s_scr[...] * jnp.exp(m_scr[...] - m_new)
                      + jnp.sum(contrib, axis=1, keepdims=True))
        m_scr[...] = m_new
        negcnt_ref[...] += jnp.sum(neg_mask.astype(jnp.float32), axis=1, keepdims=True)

        @pl.when(j == ncols - 1)
        def _():
            s = s_scr[...]
            lse_scr[...] = jnp.where(s > 0.0, m_scr[...] + jnp.log(s), F32_MIN)

    # ---- pass 1: positive-pair loss in log domain --------------------------
    @pl.when(p == 1)
    def _():
        @pl.when(j == 0)
        def _():
            loss_ref[...] = jnp.zeros_like(loss_ref)

        eye = row_g == col_g                                     # (TR, TC) via int broadcast
        pos_mask = jnp.logical_and(jnp.logical_and(lt, jnp.logical_not(eye)), in_bounds)
        log_numer = logits - jnp.square(2.0 * diff)              # log(exp(logit) * discount)
        lse_neg = lse_scr[...]                                   # (TR, 1)
        mx = jnp.maximum(log_numer, lse_neg)
        mn = jnp.minimum(log_numer, lse_neg)
        log_denom = mx + jnp.log(1.0 + jnp.exp(mn - mx))         # stable logaddexp
        loss_terms = jnp.where(pos_mask, log_denom - log_numer, 0.0)   # = -log_exp
        loss_ref[...] += jnp.sum(loss_terms, axis=1, keepdims=True)


@functools.partial(jax.jit, static_argnames=("tol_dist", "temperature", "row_block",
                                              "col_block", "mxu_dtype", "col_vmem_resident"))
def tdc_loss(embeddings, labels, *, tol_dist=2.0, temperature=0.07,
             row_block=128, col_block=256, mxu_dtype=jnp.bfloat16,
             col_vmem_resident=None):
    if embeddings.ndim != 2:
        raise ValueError("embeddings must be a 2D tensor")
    if labels.ndim != 1:
        raise ValueError("labels must be a 1D tensor")
    if embeddings.shape[0] != labels.shape[0]:
        raise ValueError("embeddings and labels must have the same length")
    if row_block % 128 != 0 or col_block % 128 != 0:
        raise ValueError("row_block / col_block must be multiples of 128")

    n, d = embeddings.shape
    tr = min(row_block, _round_up(n, 128))       # anchor-row (sublane) tile
    tc = min(col_block, _round_up(n, 128))       # column (lane) tile
    nr_pad = _round_up(n, tr)
    nc_pad = _round_up(n, tc)

    # ---- hoisted preprocessing: normalize once, fold 1/temperature into the ----
    # ---- anchor rows and 1/tol_dist into the labels, pre-transpose columns. ----
    emb32 = embeddings.astype(jnp.float32)
    inv_norm = jax.lax.rsqrt(jnp.maximum(jnp.sum(emb32 * emb32, axis=1, keepdims=True), 1e-24))
    emb_n = emb32 * inv_norm                                         # zero-padded rows stay ~0
    emb_row = jnp.pad(emb_n * (1.0 / temperature),
                      ((0, nr_pad - n), (0, 0))).astype(mxu_dtype)    # (Nr_pad, D)
    emb_colT = jnp.pad(emb_n.T, ((0, 0), (0, nc_pad - n))).astype(mxu_dtype)   # (D, Nc_pad)

    lab = labels.astype(jnp.float32) * (1.0 / tol_dist)
    lab_anchor = jnp.pad(lab, (0, nr_pad - n)).reshape(nr_pad, 1)
    lab_other = jnp.pad(lab, (0, nc_pad - n)).reshape(1, nc_pad)

    # ---- VMEM budget: keep the whole column matrix resident when it fits ----
    op_bytes = jnp.dtype(mxu_dtype).itemsize
    vmem_cap = _vmem_capacity_bytes()
    resident_bytes = 2 * d * nc_pad * op_bytes          # assume double-buffered allocation
    if col_vmem_resident is None:
        col_resident = resident_bytes <= int(0.35 * vmem_cap)
    else:
        col_resident = bool(col_vmem_resident)

    col_tile_bytes = resident_bytes if col_resident else 2 * d * tc * op_bytes
    row_tile_bytes = 2 * tr * d * op_bytes
    temp_bytes = 12 * tr * tc * 4                        # live (TR,TC) f32/mask temporaries
    small_bytes = 4 * (tr + tc) * 4 + 8 * tr * 4
    vmem_limit = int(min(max(row_tile_bytes + col_tile_bytes + temp_bytes + small_bytes
                             + (4 << 20), 32 << 20),
                         vmem_cap - (4 << 20)))

    if col_resident:
        col_spec = pl.BlockSpec((d, nc_pad), lambda i, p, j: (0, 0))   # DMAed once, never changes
    else:
        col_spec = pl.BlockSpec((d, tc), lambda i, p, j: (0, j))       # streamed per column tile

    kernel = functools.partial(_tdc_kernel, n, tr, tc, col_resident)

    grid_spec = pltpu.PrefetchScalarGridSpec(
        num_scalar_prefetch=0,
        grid=(nr_pad // tr, 2, nc_pad // tc),
        in_specs=(
            pl.BlockSpec((tr, d), lambda i, p, j: (i, 0)),   # anchor-row embeddings (bf16, *1/T)
            col_spec,                                        # column embeddings^T
            pl.BlockSpec((tr, 1), lambda i, p, j: (i, 0)),   # anchor labels (*1/tol)
            pl.BlockSpec((1, tc), lambda i, p, j: (0, j)),   # column labels (*1/tol)
        ),
        out_specs=(
            pl.BlockSpec((tr, 1), lambda i, p, j: (i, 0)),   # per-anchor loss sum
            pl.BlockSpec((tr, 1), lambda i, p, j: (i, 0)),   # per-anchor #negatives
        ),
        scratch_shapes=(
            pltpu.VMEM((tr, 1), jnp.float32),   # running neg max
            pltpu.VMEM((tr, 1), jnp.float32),   # running neg sumexp
            pltpu.VMEM((tr, 1), jnp.float32),   # finalized per-anchor LSE
        ),
    )

    per_loss, per_neg = pl.pallas_call(
        kernel,
        grid_spec=grid_spec,
        out_shape=(
            jax.ShapeDtypeStruct((nr_pad, 1), jnp.float32),
            jax.ShapeDtypeStruct((nr_pad, 1), jnp.float32),
        ),
        compiler_params=pltpu.CompilerParams(
            dimension_semantics=("parallel", "arbitrary", "arbitrary"),
            vmem_limit_bytes=vmem_limit),
    )(emb_row, emb_colT, lab_anchor, lab_other)

    # Scalar epilogue (kept in f32: per-anchor counts < 2^24 are exact, no int32
    # overflow): PyTorch early-return-0 gates + mean over positive pairs.
    n_f = jnp.float32(n)
    num_neg = jnp.sum(per_neg)                      # padded rows contributed 0
    num_pos = n_f * (n_f - 1.0) - num_neg           # off-diagonal pairs that aren't negatives
    sum_loss = jnp.sum(per_loss)
    valid = jnp.logical_and(
        jnp.logical_and(num_pos > 0.0, num_neg > 0.0),
        jnp.logical_not(jnp.logical_and(num_pos <= 1.0, num_neg <= 1.0)))
    return jnp.where(valid, sum_loss / jnp.maximum(num_pos, 1.0), 0.0)


def reference_tdc_loss(emb, labels, tol_dist, temperature):
    """Per-anchor numpy (f64) replica of the PyTorch gather-based loss."""
    emb = np.asarray(emb, np.float64)
    labels = np.asarray(labels, np.float64)
    n = labels.shape[0]
    diff = np.abs(labels[:, None] - labels[None, :]) / tol_dist
    matches = diff < 1.0
    negatives = ~matches
    np.fill_diagonal(matches, False)
    num_pos = int(matches.sum())
    num_neg = int(negatives.sum())
    if (num_pos <= 1 and num_neg <= 1) or num_pos == 0 or num_neg == 0:
        return 0.0
    xn = emb / np.maximum(np.linalg.norm(emb, axis=1, keepdims=True), 1e-12)
    logits = (xn @ xn.T) / temperature
    tiny = float(np.finfo(np.float32).tiny)
    total = 0.0
    for i in range(n):
        p_idx = np.where(matches[i])[0]
        if p_idx.size == 0:
            continue
        lp = logits[i, p_idx]
        dpos = diff[i, p_idx]
        ln = logits[i, negatives[i]]
        nmax = ln.max() if ln.size else -np.inf
        m = np.maximum(lp, nmax)
        numer = np.exp(lp - m) * np.exp(-np.square(2.0 * dpos))
        neg_sum = np.exp(ln[None, :] - m[:, None]).sum(axis=1) if ln.size else 0.0
        denom = neg_sum + numer
        total += float(np.sum(-np.log(numer / denom + tiny)))
    return total / num_pos


if __name__ == "__main__":
    key = jax.random.PRNGKey(0)
    k1, k2, k3, k4 = jax.random.split(key, 4)

    # small single-tile case, default bf16 MXU operands + auto column residency
    n, d = 16, 32
    emb = jax.random.normal(k1, (n, d), dtype=jnp.float32)
    lab = jax.random.uniform(k2, (n,), minval=0.0, maxval=10.0, dtype=jnp.float32)
    loss = tdc_loss(emb, lab)
    jax.block_until_ready(loss)
    ref = reference_tdc_loss(np.array(emb), np.array(lab), 2.0, 0.07)
    assert np.allclose(float(loss), ref, rtol=3e-2, atol=1e-2), (float(loss), ref)

    # multi-tile case: N=200, 128x128 tiles -> grid (2,2,2), VMEM-resident columns
    n2, d2 = 200, 64
    emb2 = jax.random.normal(k3, (n2, d2), dtype=jnp.float32)
    lab2 = jax.random.uniform(k4, (n2,), minval=0.0, maxval=10.0, dtype=jnp.float32)
    loss2 = tdc_loss(emb2, lab2, row_block=128, col_block=128)
    jax.block_until_ready(loss2)
    ref2 = reference_tdc_loss(np.array(emb2), np.array(lab2), 2.0, 0.07)
    assert np.allclose(float(loss2), ref2, rtol=3e-2, atol=1e-2), (float(loss2), ref2)

    # streamed-column + f32-operand path, tight tolerance vs the f64 reference
    loss3 = tdc_loss(emb2, lab2, row_block=128, col_block=128,
                     mxu_dtype=jnp.float32, col_vmem_resident=False)
    jax.block_until_ready(loss3)
    assert np.allclose(float(loss3), ref2, rtol=2e-4, atol=1e-4), (float(loss3), ref2)

    # degenerate cases must hit the PyTorch early-return-0 path
    zero1 = tdc_loss(emb, jnp.full((n,), 3.0))                        # no negatives
    zero2 = tdc_loss(emb, jnp.arange(n, dtype=jnp.float32) * 100.0)   # no positives
    jax.block_until_ready((zero1, zero2))
    assert float(zero1) == 0.0 and float(zero2) == 0.0, (float(zero1), float(zero2))

    print("KERNEL_OK")
</pallas_src>

<mosaic_0001>
module attributes {stable_mosaic.version = 11 : i64} {
  func.func @_tdc_kernel(%arg0: i32, %arg1: i32, %arg2: i32, %arg3: memref<128x32xbf16, #tpu.memory_space<vmem>>, %arg4: memref<32x128xbf16, #tpu.memory_space<vmem>>, %arg5: memref<128x1xf32, #tpu.memory_space<vmem>>, %arg6: memref<1x128xf32, #tpu.memory_space<vmem>>, %arg7: memref<128x1xf32, #tpu.memory_space<vmem>>, %arg8: memref<128x1xf32, #tpu.memory_space<vmem>>, %arg9: memref<128x1xf32, #tpu.memory_space<vmem>>, %arg10: memref<128x1xf32, #tpu.memory_space<vmem>>, %arg11: memref<128x1xf32, #tpu.memory_space<vmem>>) attributes {dimension_semantics = [#tpu.dimension_semantics<parallel>, #tpu.dimension_semantics<arbitrary>, #tpu.dimension_semantics<arbitrary>], iteration_bounds = array<i64: 1, 2, 1>, scalar_prefetch = 0 : i64, scratch_operands = 3 : i64, tpu.core_type = #tpu.core_type<tc>, window_params = [{transform_indices = @transform_0, window_bounds = array<i64: 128, 32>}, {pipeline_mode = #tpu.pipeline_mode<synchronous>, transform_indices = @transform_1, window_bounds = array<i64: 32, 128>}, {transform_indices = @transform_2, window_bounds = array<i64: 128, 1>}, {transform_indices = @transform_3, window_bounds = array<i64: 1, 128>}, {transform_indices = @transform_4, window_bounds = array<i64: 128, 1>}, {transform_indices = @transform_5, window_bounds = array<i64: 128, 1>}]} {
    %c0 = arith.constant 0 : index
    %c0_0 = arith.constant 0 : index
    %0 = vector.load %arg3[%c0, %c0_0] : memref<128x32xbf16, #tpu.memory_space<vmem>>, vector<128x32xbf16>
    %c128_i32 = arith.constant 128 : i32
    %1 = arith.muli %arg2, %c128_i32 : i32
    %2 = tpu.assume_multiple %1, 128 : i32
    %c0_1 = arith.constant 0 : index
    %3 = arith.index_cast %2 : i32 to index
    %4 = vector.load %arg4[%c0_1, %3] : memref<32x128xbf16, #tpu.memory_space<vmem>>, vector<32x128xbf16>
    %cst = arith.constant dense<0.000000e+00> : vector<128x128xf32>
    %5 = tpu.matmul %0, %4, %cst {dimension_numbers = #tpu.dot_dimension_numbers<[1], [0], [0], [1], [0, 0, 1, 1], [], []>} : vector<128x32xbf16>, vector<32x128xbf16>, vector<128x128xf32> -> vector<128x128xf32>
    %c0_2 = arith.constant 0 : index
    %c0_3 = arith.constant 0 : index
    %6 = vector.load %arg5[%c0_2, %c0_3] : memref<128x1xf32, #tpu.memory_space<vmem>>, vector<128x1xf32>
    %c0_4 = arith.constant 0 : index
    %c0_5 = arith.constant 0 : index
    %7 = vector.load %arg6[%c0_4, %c0_5] : memref<1x128xf32, #tpu.memory_space<vmem>>, vector<1x128xf32>
    %8 = vector.broadcast %6 : vector<128x1xf32> to vector<128x128xf32>
    %9 = vector.broadcast %7 : vector<1x128xf32> to vector<128x128xf32>
    %10 = arith.subf %8, %9 : vector<128x128xf32>
    %11 = math.absf %10 : vector<128x128xf32>
    %cst_6 = arith.constant 1.000000e+00 : f32
    %12 = vector.broadcast %cst_6 : f32 to vector<128x128xf32>
    %13 = arith.cmpf olt, %11, %12 : vector<128x128xf32>
    %c128_i32_7 = arith.constant 128 : i32
    %14 = arith.muli %arg0, %c128_i32_7 : i32
    %15 = tpu.iota {dimensions = array<i32: 0>} : vector<128x1xi32>
    %16 = vector.broadcast %14 : i32 to vector<128x1xi32>
    %17 = arith.addi %16, %15 : vector<128x1xi32>
    %c128_i32_8 = arith.constant 128 : i32
    %18 = arith.muli %arg2, %c128_i32_8 : i32
    %19 = tpu.iota {dimensions = array<i32: 1>} : vector<1x128xi32>
    %20 = vector.broadcast %18 : i32 to vector<1x128xi32>
    %21 = arith.addi %20, %19 : vector<1x128xi32>
    %22 = vector.broadcast %17 : vector<128x1xi32> to vector<128x128xi32>
    %23 = vector.broadcast %21 : vector<1x128xi32> to vector<128x128xi32>
    %24 = arith.maxsi %22, %23 : vector<128x128xi32>
    %c16_i32 = arith.constant 16 : i32
    %25 = vector.broadcast %c16_i32 : i32 to vector<128x128xi32>
    %26 = arith.cmpi slt, %24, %25 : vector<128x128xi32>
    %c0_i32 = arith.constant 0 : i32
    %27 = arith.cmpi eq, %arg1, %c0_i32 : i32
    %28 = arith.extui %27 : i1 to i32
    %c0_i32_9 = arith.constant 0 : i32
    %29 = arith.cmpi ne, %28, %c0_i32_9 : i32
    scf.if %29 {
      %c0_i32_11 = arith.constant 0 : i32
      %33 = arith.cmpi eq, %arg2, %c0_i32_11 : i32
      %34 = arith.extui %33 : i1 to i32
      %c0_i32_12 = arith.constant 0 : i32
      %35 = arith.cmpi ne, %34, %c0_i32_12 : i32
      scf.if %35 {
        %cst_36 = arith.constant -3.40282347E+38 : f32
        %71 = vector.broadcast %cst_36 : f32 to vector<128x1xf32>
        %c0_37 = arith.constant 0 : index
        %c0_38 = arith.constant 0 : index
        %72 = vector.load %arg9[%c0_37, %c0_38] : memref<128x1xf32, #tpu.memory_space<vmem>>, vector<128x1xf32>
        tpu.vector_store %arg9[%c0_37, %c0_38], %71 {strides = array<i32>} : memref<128x1xf32, #tpu.memory_space<vmem>>, vector<128x1xf32>,
        %cst_39 = arith.constant 0.000000e+00 : f32
        %73 = vector.broadcast %cst_39 : f32 to vector<128x1xf32>
        %c0_40 = arith.constant 0 : index
        %c0_41 = arith.constant 0 : index
        %74 = vector.load %arg10[%c0_40, %c0_41] : memref<128x1xf32, #tpu.memory_space<vmem>>, vector<128x1xf32>
        tpu.vector_store %arg10[%c0_40, %c0_41], %73 {strides = array<i32>} : memref<128x1xf32, #tpu.memory_space<vmem>>, vector<128x1xf32>,
        %cst_42 = arith.constant 0.000000e+00 : f32
        %75 = vector.broadcast %cst_42 : f32 to vector<128x1xf32>
        %c0_43 = arith.constant 0 : index
        %c0_44 = arith.constant 0 : index
        %76 = vector.load %arg8[%c0_43, %c0_44] : memref<128x1xf32, #tpu.memory_space<vmem>>, vector<128x1xf32>
        tpu.vector_store %arg8[%c0_43, %c0_44], %75 {strides = array<i32>} : memref<128x1xf32, #tpu.memory_space<vmem>>, vector<128x1xf32>,
      } else {
      }
      %cst_13 = arith.constant dense<true> : vector<128x128xi1>
      %36 = arith.xori %13, %cst_13 : vector<128x128xi1>
      %37 = arith.andi %36, %26 : vector<128x128xi1>
      %cst_14 = arith.constant -3.40282347E+38 : f32
      %38 = vector.broadcast %cst_14 : f32 to vector<128x128xf32>
      %39 = arith.select %37, %5, %38 : vector<128x128xi1>, vector<128x128xf32>
      %c0_15 = arith.constant 0 : index
      %c0_16 = arith.constant 0 : index
      %40 = vector.load %arg9[%c0_15, %c0_16] : memref<128x1xf32, #tpu.memory_space<vmem>>, vector<128x1xf32>
      %cst_17 = arith.constant dense<0xFF800000> : vector<128xf32>
      %41 = vector.multi_reduction <maximumf>, %39, %cst_17 [1] : vector<128x128xf32> to vector<128xf32>
      %42 = vector.shape_cast %41 : vector<128xf32> to vector<128x1xf32>
      %43 = arith.maximumf %40, %42 : vector<128x1xf32>
      %44 = vector.broadcast %43 : vector<128x1xf32> to vector<128x128xf32>
      %45 = arith.subf %5, %44 : vector<128x128xf32>
      %cst_18 = arith.constant 0.000000e+00 : f32
      %46 = vector.broadcast %cst_18 : f32 to vector<128x128xf32>
      %47 = arith.minimumf %45, %46 : vector<128x128xf32>
      %48 = math.exp %47 : vector<128x128xf32>
      %cst_19 = arith.constant 0.000000e+00 : f32
      %49 = vector.broadcast %cst_19 : f32 to vector<128x128xf32>
      %50 = arith.select %37, %48, %49 : vector<128x128xi1>, vector<128x128xf32>
      %c0_20 = arith.constant 0 : index
      %c0_21 = arith.constant 0 : index
      %51 = vector.load %arg10[%c0_20, %c0_21] : memref<128x1xf32, #tpu.memory_space<vmem>>, vector<128x1xf32>
      %c0_22 = arith.constant 0 : index
      %c0_23 = arith.constant 0 : index
      %52 = vector.load %arg9[%c0_22, %c0_23] : memref<128x1xf32, #tpu.memory_space<vmem>>, vector<128x1xf32>
      %53 = arith.subf %52, %43 : vector<128x1xf32>
      %54 = math.exp %53 : vector<128x1xf32>
      %55 = arith.mulf %51, %54 : vector<128x1xf32>
      %cst_24 = arith.constant dense<0.000000e+00> : vector<128xf32>
      %56 = vector.multi_reduction <add>, %50, %cst_24 [1] : vector<128x128xf32> to vector<128xf32>
      %57 = vector.shape_cast %56 : vector<128xf32> to vector<128x1xf32>
      %58 = arith.addf %55, %57 : vector<128x1xf32>
      %c0_25 = arith.constant 0 : index
      %c0_26 = arith.constant 0 : index
      %59 = vector.load %arg10[%c0_25, %c0_26] : memref<128x1xf32, #tpu.memory_space<vmem>>, vector<128x1xf32>
      tpu.vector_store %arg10[%c0_25, %c0_26], %58 {strides = array<i32>} : memref<128x1xf32, #tpu.memory_space<vmem>>, vector<128x1xf32>,
      %c0_27 = arith.constant 0 : index
      %c0_28 = arith.constant 0 : index
      %60 = vector.load %arg9[%c0_27, %c0_28] : memref<128x1xf32, #tpu.memory_space<vmem>>, vector<128x1xf32>
      tpu.vector_store %arg9[%c0_27, %c0_28], %43 {strides = array<i32>} : memref<128x1xf32, #tpu.memory_space<vmem>>, vector<128x1xf32>,
      %c0_29 = arith.constant 0 : index
      %c0_30 = arith.constant 0 : index
      %61 = vector.load %arg8[%c0_29, %c0_30] : memref<128x1xf32, #tpu.memory_space<vmem>>, vector<128x1xf32>
      %62 = arith.extui %37 : vector<128x128xi1> to vector<128x128xi32>
      %63 = arith.sitofp %62 : vector<128x128xi32> to vector<128x128xf32>
      %cst_31 = arith.constant dense<0.000000e+00> : vector<128xf32>
      %64 = vector.multi_reduction <add>, %63, %cst_31 [1] : vector<128x128xf32> to vector<128xf32>
      %65 = vector.shape_cast %64 : vector<128xf32> to vector<128x1xf32>
      %66 = arith.addf %61, %65 : vector<128x1xf32>
      %c0_32 = arith.constant 0 : index
      %c0_33 = arith.constant 0 : index
      %67 = vector.load %arg8[%c0_32, %c0_33] : memref<128x1xf32, #tpu.memory_space<vmem>>, vector<128x1xf32>
      tpu.vector_store %arg8[%c0_32, %c0_33], %66 {strides = array<i32>} : memref<128x1xf32, #tpu.memory_space<vmem>>, vector<128x1xf32>,
      %c0_i32_34 = arith.constant 0 : i32
      %68 = arith.cmpi eq, %arg2, %c0_i32_34 : i32
      %69 = arith.extui %68 : i1 to i32
      %c0_i32_35 = arith.constant 0 : i32
      %70 = arith.cmpi ne, %69, %c0_i32_35 : i32
      scf.if %70 {
        %c0_36 = arith.constant 0 : index
        %c0_37 = arith.constant 0 : index
        %71 = vector.load %arg10[%c0_36, %c0_37] : memref<128x1xf32, #tpu.memory_space<vmem>>, vector<128x1xf32>
        %cst_38 = arith.constant 0.000000e+00 : f32
        %72 = vector.broadcast %cst_38 : f32 to vector<128x1xf32>
        %73 = arith.cmpf ogt, %71, %72 : vector<128x1xf32>
        %c0_39 = arith.constant 0 : index
        %c0_40 = arith.constant 0 : index
        %74 = vector.load %arg9[%c0_39, %c0_40] : memref<128x1xf32, #tpu.memory_space<vmem>>, vector<128x1xf32>
        %75 = math.log %71 : vector<128x1xf32>
        %76 = arith.addf %74, %75 : vector<128x1xf32>
        %cst_41 = arith.constant -3.40282347E+38 : f32
        %77 = vector.broadcast %cst_41 : f32 to vector<128x1xf32>
        %78 = arith.select %73, %76, %77 : vector<128x1xi1>, vector<128x1xf32>
        %c0_42 = arith.constant 0 : index
        %c0_43 = arith.constant 0 : index
        %79 = vector.load %arg11[%c0_42, %c0_43] : memref<128x1xf32, #tpu.memory_space<vmem>>, vector<128x1xf32>
        tpu.vector_store %arg11[%c0_42, %c0_43], %78 {strides = array<i32>} : memref<128x1xf32, #tpu.memory_space<vmem>>, vector<128x1xf32>,
      } else {
      }
    } else {
    }
    %c1_i32 = arith.constant 1 : i32
    %30 = arith.cmpi eq, %arg1, %c1_i32 : i32
    %31 = arith.extui %30 : i1 to i32
    %c0_i32_10 = arith.constant 0 : i32
    %32 = arith.cmpi ne, %31, %c0_i32_10 : i32
    scf.if %32 {
      %c0_i32_11 = arith.constant 0 : i32
      %33 = arith.cmpi eq, %arg2, %c0_i32_11 : i32
      %34 = arith.extui %33 : i1 to i32
      %c0_i32_12 = arith.constant 0 : i32
      %35 = arith.cmpi ne, %34, %c0_i32_12 : i32
      scf.if %35 {
        %cst_24 = arith.constant 0.000000e+00 : f32
        %65 = vector.broadcast %cst_24 : f32 to vector<128x1xf32>
        %c0_25 = arith.constant 0 : index
        %c0_26 = arith.constant 0 : index
        %66 = vector.load %arg7[%c0_25, %c0_26] : memref<128x1xf32, #tpu.memory_space<vmem>>, vector<128x1xf32>
        tpu.vector_store %arg7[%c0_25, %c0_26], %65 {strides = array<i32>} : memref<128x1xf32, #tpu.memory_space<vmem>>, vector<128x1xf32>,
      } else {
      }
      %36 = vector.broadcast %17 : vector<128x1xi32> to vector<128x128xi32>
      %37 = vector.broadcast %21 : vector<1x128xi32> to vector<128x128xi32>
      %38 = arith.cmpi eq, %36, %37 : vector<128x128xi32>
      %cst_13 = arith.constant dense<true> : vector<128x128xi1>
      %39 = arith.xori %38, %cst_13 : vector<128x128xi1>
      %40 = arith.andi %13, %39 : vector<128x128xi1>
      %41 = arith.andi %40, %26 : vector<128x128xi1>
      %cst_14 = arith.constant 2.000000e+00 : f32
      %42 = vector.broadcast %cst_14 : f32 to vector<128x128xf32>
      %43 = arith.mulf %42, %11 : vector<128x128xf32>
      %44 = arith.mulf %43, %43 : vector<128x128xf32>
      %45 = arith.subf %5, %44 : vector<128x128xf32>
      %c0_15 = arith.constant 0 : index
      %c0_16 = arith.constant 0 : index
      %46 = vector.load %arg11[%c0_15, %c0_16] : memref<128x1xf32, #tpu.memory_space<vmem>>, vector<128x1xf32>
      %47 = vector.broadcast %46 : vector<128x1xf32> to vector<128x128xf32>
      %48 = arith.maximumf %45, %47 : vector<128x128xf32>
      %49 = vector.broadcast %46 : vector<128x1xf32> to vector<128x128xf32>
      %50 = arith.minimumf %45, %49 : vector<128x128xf32>
      %51 = arith.subf %50, %48 : vector<128x128xf32>
      %52 = math.exp %51 : vector<128x128xf32>
      %cst_17 = arith.constant 1.000000e+00 : f32
      %53 = vector.broadcast %cst_17 : f32 to vector<128x128xf32>
      %54 = arith.addf %53, %52 : vector<128x128xf32>
      %55 = math.log %54 : vector<128x128xf32>
      %56 = arith.addf %48, %55 : vector<128x128xf32>
      %57 = arith.subf %56, %45 : vector<128x128xf32>
      %cst_18 = arith.constant 0.000000e+00 : f32
      %58 = vector.broadcast %cst_18 : f32 to vector<128x128xf32>
      %59 = arith.select %41, %57, %58 : vector<128x128xi1>, vector<128x128xf32>
      %c0_19 = arith.constant 0 : index
      %c0_20 = arith.constant 0 : index
      %60 = vector.load %arg7[%c0_19, %c0_20] : memref<128x1xf32, #tpu.memory_space<vmem>>, vector<128x1xf32>
      %cst_21 = arith.constant dense<0.000000e+00> : vector<128xf32>
      %61 = vector.multi_reduction <add>, %59, %cst_21 [1] : vector<128x128xf32> to vector<128xf32>
      %62 = vector.shape_cast %61 : vector<128xf32> to vector<128x1xf32>
      %63 = arith.addf %60, %62 : vector<128x1xf32>
      %c0_22 = arith.constant 0 : index
      %c0_23 = arith.constant 0 : index
      %64 = vector.load %arg7[%c0_22, %c0_23] : memref<128x1xf32, #tpu.memory_space<vmem>>, vector<128x1xf32>
      tpu.vector_store %arg7[%c0_22, %c0_23], %63 {strides = array<i32>} : memref<128x1xf32, #tpu.memory_space<vmem>>, vector<128x1xf32>,
    } else {
    }
    return
  }
  func.func @transform_0(%arg0: i32, %arg1: i32, %arg2: i32) -> (i32, i32) {
    %c0_i32 = arith.constant 0 : i32
    %c0_i32_0 = arith.constant 0 : i32
    return %arg0, %c0_i32 : i32, i32
  }
  func.func @transform_1(%arg0: i32, %arg1: i32, %arg2: i32) -> (i32, i32) {
    %c0_i32 = arith.constant 0 : i32
    %c0_i32_0 = arith.constant 0 : i32
    %c0_i32_1 = arith.constant 0 : i32
    return %c0_i32, %c0_i32_0 : i32, i32
  }
  func.func @transform_2(%arg0: i32, %arg1: i32, %arg2: i32) -> (i32, i32) {
    %c0_i32 = arith.constant 0 : i32
    %c0_i32_0 = arith.constant 0 : i32
    return %arg0, %c0_i32 : i32, i32
  }
  func.func @transform_3(%arg0: i32, %arg1: i32, %arg2: i32) -> (i32, i32) {
    %c0_i32 = arith.constant 0 : i32
    %c0_i32_0 = arith.constant 0 : i32
    return %c0_i32, %arg2 : i32, i32
  }
  func.func @transform_4(%arg0: i32, %arg1: i32, %arg2: i32) -> (i32, i32) {
    %c0_i32 = arith.constant 0 : i32
    %c0_i32_0 = arith.constant 0 : i32
    return %arg0, %c0_i32 : i32, i32
  }
  func.func @transform_5(%arg0: i32, %arg1: i32, %arg2: i32) -> (i32, i32) {
    %c0_i32 = arith.constant 0 : i32
    %c0_i32_0 = arith.constant 0 : i32
    return %arg0, %c0_i32 : i32, i32
  }
}

</mosaic_0001>

<bundles_post_ra>
// kernel: tdc_loss.1
= control target key start
LH: loop header
LB: loop body
LE: loop exit
PB: predicated region body
PF: predicated region fallthrough
CT: control target
= control target key end

     0   :  { %s2291_s18 = smov 0   ;;  %s2293_s19 = smov 0   ;;  %s3108_s0 = inlined_call_operand.vmem [shape: bf16[128,32], index: 0, kind: input, shape index: {}]   ;;  %s3109_s1 = inlined_call_operand.vmem [shape: bf16[32,128], index: 1, kind: input, shape index: {}]   ;;  %s3110_s2 = inlined_call_operand.vmem [shape: f32[128,1], index: 2, kind: input, shape index: {}]   ;;  %s3111_s3 = inlined_call_operand.vmem [shape: f32[1,128], index: 3, kind: input, shape index: {}]   ;;  %s3112_s4 = inlined_call_operand.vmem [shape: f32[128,1], index: 4, kind: output, shape index: {0}]   ;;  %s3113_s5 = inlined_call_operand.vmem [shape: f32[128,1], index: 5, kind: output, shape index: {1}]  }
   0x1   :  { %s2295_s20 = smov 0  }
   0x2 LB: > { %s31_s21 = sadd.s32 1, %s2247_s19  ;;  %p2040_p0 = scmp.ge.s32.totalorder %s2251_s20, 1  ;;  %s2251_s20 = sphi %s2295_s20, %s16_s20   ;;  %s2247_s19 = sphi %s2293_s19, %s3121_s19   ;;  %s2243_s18 = sphi %s2291_s18, %s3120_s18  }
   0x3   : > { %p33_p1 = scmp.ge.s32.totalorder %s31_s21, 2  ;;  %p229_p2 = scmp.lt.s32.totalorder %s2251_s20, 3 }
   0x5   : > { %s3123_s21 = smov (%p33_p1, %s31_s21), 0  ;;  %p230_p3 = pnand %p2040_p0, %p229_p2 }
   0x6   : > { %p2089_p4 = scmp.ne.s32.totalorder (!%p230_p3), %s2243_s18, 0 }
   0x7   : > { %233 = sbr.rel (%p230_p3) target bundleno = 868 (0x364), region = 36 }
   0xc   : > { %v2108_v0 = vld [vmem:[%s3109_s1 + $0x8] sm:$0xff]  ;;  %v2253_v1 = vmov 0   ;;  %v2107_v2 = vld [vmem:[%s3109_s1] sm:$0xff]  ;;  %v2101_v5 = vld [vmem:[%s3108_s0 + $0x10] sm:$0xff]  ;;  %vm375_vm0 = vcmask 261120   ;;  %v598_v17 = vlaneseq }
   0xd   : > { %2147 = vset.pattern.permute.xlu0 %v2253_v1  ;;  %406 = vmatpush.bf16.msra.mxu0 %v2108_v0  ;;  %v449_v3 = vld [vmem:[%s3110_s2] sm:$0xff]  ;;  %v2105_v7 = vld [vmem:[%s3108_s0 + $0x30] sm:$0xff]  ;;  %v450_v8 = vld [vmem:[%s3110_s2 + $0x8] sm:$0xff] }
   0xe   : > { %2109 = vmatpush.bf16.msra.mxu1 %v2108_v0  ;;  %2110 = vmatpush.bf16.msra.mxu2 %v2108_v0  ;;  %v2099_v4 = vld [vmem:[%s3108_s0] sm:$0xff]  ;;  %v2100_v9 = vld [vmem:[%s3108_s0 + $0x8] sm:$0xff]  ;;  %v2102_v10 = vld [vmem:[%s3108_s0 + $0x18] sm:$0xff]  ;;  %v2361_v20 = vshrl.u32 %v598_v17, 7  ;;  %v2368_v23 = vand.u32 127, %v598_v17 }
   0xf   : > { %2111 = vmatpush.bf16.msra.mxu3 %v2108_v0  ;;  %468 = vperm.xlu0 %2147, %v449_v3   ;;  %v2103_v6 = vld [vmem:[%s3108_s0 + $0x20] sm:$0xff]  ;;  %v2104_v11 = vld [vmem:[%s3108_s0 + $0x28] sm:$0xff]  ;;  %v2106_v12 = vld [vmem:[%s3108_s0 + $0x38] sm:$0xff] }
  0x10   : > { %v2148_v13 = vld [vmem:[%s3111_s3] ss:$0 sm:$0xff]  ;;  %v2366_v22 = vadd.s32 8, %v2361_v20  ;;  %vm636_vm3 = vcmp.gt.s32.totalorder %v2361_v20, %v2368_v23 }
  0x11   : > { %407 = vmatpush.bf16.msra.mxu0 %v2107_v2  ;;  %v2377_v24 = vsel %vm636_vm3, %v2361_v20, %v2368_v23 }
  0x12   : > { %2112 = vmatpush.bf16.msra.mxu1 %v2107_v2  ;;  %2113 = vmatpush.bf16.msra.mxu2 %v2107_v2  ;;  %vm638_vm4 = vcmp.gt.s32.totalorder %v2366_v22, %v2368_v23  ;;  %vm668_vm5 = vcmp.lt.s32.totalorder %v2377_v24, 16 }
  0x13   : > { %2114 = vmatpush.bf16.msra.mxu3 %v2107_v2  ;;  %v2381_v25 = vsel %vm638_vm4, %v2366_v22, %v2368_v23 }
  0x14   : > { %2081 = vmatmul.msk.bf16.vlgmr.msra.gmra.mxu0 %vm375_vm0, %v2099_v4  ;;  %vm669_vm6 = vcmp.lt.s32.totalorder %v2381_v25, 16 }
  0x15   : > { %2083 = vmatmul.msk.bf16.vlgmr.msra.gmra.mxu1 %vm375_vm0, %v2101_v5  ;;  %2085 = vmatmul.msk.bf16.vlgmr.msra.gmra.mxu2 %vm375_vm0, %v2103_v6 }
  0x16   : > { %2087 = vmatmul.msk.bf16.vlgmr.msra.gmra.mxu3 %vm375_vm0, %v2105_v7 }
  0x17   : > { %473 = vperm.xlu0 %2147, %v450_v8  }
  0x24   : > { %2082 = vmatmul.msk.bf16.gmra.mxu0 %vm375_vm0, %v2100_v9 }
  0x25   : > { %2084 = vmatmul.msk.bf16.gmra.mxu1 %vm375_vm0, %v2102_v10  ;;  %2086 = vmatmul.msk.bf16.gmra.mxu2 %vm375_vm0, %v2104_v11 }
  0x26   : > { %2088 = vmatmul.msk.bf16.gmra.mxu3 %vm375_vm0, %v2106_v12 }
  0x81   : > { %v469_v14 = vpop.permute.xlu0 %468 }
  0x82   : > { %v549_v15 = vsub.f32 %v469_v14, %v2148_v13 }
  0x84   : > { %v2358_v16 = vand.u32 2147483647, %v549_v15 }
  0x86   : > { %vm581_vm1 = vcmp.lt.f32.partialorder %v2358_v16, 1.0 }
  0x89   : > { %v474_v18 = vpop.permute.xlu0 %473 }
  0x8a   : > { %v550_v19 = vsub.f32 %v474_v18, %v2148_v13 }
  0x8c   : > { %v2363_v21 = vand.u32 2147483647, %v550_v19 }
  0x8e   : > { %vm582_vm2 = vcmp.lt.f32.partialorder %v2363_v21, 1.0 }
  0x91   : > { %v2385_v26 = vpop.f32.mrf.mxu0 }
  0x92   : > { %v419_v27 = vpop.f32.mrf.mxu1 }
  0x98   : > { %v429_v28 = vpop.f32.mrf.mxu2 }
  0x99   : > { %v439_v29 = vpop.f32.mrf.mxu3  ;;  %v2387_v30 = vpop.f32.mrf.mxu0 }
  0x9a   : > { %v421_v31 = vpop.f32.mrf.mxu1 }
  0xa0   : > { %v431_v32 = vpop.f32.mrf.mxu2 }
  0xa1   : > { %v441_v33 = vpop.f32.mrf.mxu3  ;;  %v414_v34 = vpop.f32.mrf.mxu0 }
  0xa2   : > { %v424_v35 = vpop.f32.mrf.mxu1 }
  0xa8   : > { %v434_v36 = vpop.f32.mrf.mxu2 }
  0xa9   : > { %v444_v37 = vpop.f32.mrf.mxu3  ;;  %v416_v38 = vpop.f32.mrf.mxu0 }
  0xaa   : > { %v426_v39 = vpop.f32.mrf.mxu1 }
  0xad   : > { %687 = sbr.rel (%p2089_p4) target bundleno = 580 (0x244), region = 40 }
  0xb0   : > { %v436_v40 = vpop.f32.mrf.mxu2 }
  0xb1   : > { %v446_v41 = vpop.f32.mrf.mxu3 }
  0xb2   : > { %vm2254_vm7 = vmmov 1   ;;  %v2255_v42 = vmov -3.4028235e+38   ;;  %v2256_v47 = vmov 0.0   ;;  %vm692_vm12 = vcmask 7168  }
  0xb3   : > { %vm741_vm8 = vmxor %vm581_vm1, %vm2254_vm7  ;;  %813 = vmax.xlane.f32.xlu2 %v2255_v42  ;;  %809 = vmax.xlane.f32.xlu1 %v2255_v42  ;;  %693 = vst.msk [vmem:[#allocation2] sm:$0xff] %vm692_vm12, %v2255_v42  ;;  %v2257_v48 = vmov 0  }
  0xb4   : > { %vm2394_vm9 = vmand %vm741_vm8, %vm668_vm5  ;;  %694 = vst.msk [vmem:[#allocation2 + $0x8] sm:$0xff] %vm692_vm12, %v2255_v42  ;;  %2149 = vset.pattern.permute.xlu1 %v2257_v48  ;;  %2150 = vset.pattern.permute.xlu2 %v2257_v48 }
  0xb5   : > { %v773_v44 = vsel %vm2394_vm9, %v2385_v26, -3.4028235e+38  ;;  %vm742_vm10 = vmxor %vm582_vm2, %vm2254_vm7  ;;  %695 = vst.msk [vmem:[#allocation2 + $0x10] sm:$0xff] %vm692_vm12, %v2255_v42  ;;  %2151 = vset.pattern.permute.xlu0 %v2257_v48 }
  0xb6   : > { %805 = vmax.xlane.f32.xlu0 %v773_v44  ;;  %vm2405_vm11 = vmand %vm742_vm10, %vm669_vm6  ;;  %696 = vst.msk [vmem:[#allocation2 + $0x18] sm:$0xff] %vm692_vm12, %v2255_v42 }
  0xb7   : > { %v774_v46 = vsel %vm2405_vm11, %v2387_v30, -3.4028235e+38  ;;  %697 = vst.msk [vmem:[#allocation2 + $0x20] sm:$0xff] %vm692_vm12, %v2255_v42 }
  0xb8   : > { %698 = vst.msk [vmem:[#allocation2 + $0x28] sm:$0xff] %vm692_vm12, %v2255_v42 }
  0xb9   : > { %699 = vst.msk [vmem:[#allocation2 + $0x30] sm:$0xff] %vm692_vm12, %v2255_v42 }
  0xba   : > { %700 = vst.msk [vmem:[#allocation2 + $0x38] sm:$0xff] %vm692_vm12, %v2255_v42  ;;  %v2496_v51 = vld [vmem:[#allocation2] sm:$0xff] }
  0xbb   : > { %815 = vmax.xlane.f32.xlu2 %v2255_v42  ;;  %811 = vmax.xlane.f32.xlu1 %v2255_v42  ;;  %701 = vst.msk [vmem:[#allocation2 + $0x40] sm:$0xff] %vm692_vm12, %v2255_v42  ;;  %v2547_v58 = vld [vmem:[#allocation2 + $0x8] sm:$0xff] }
  0xbc   : > { %702 = vst.msk [vmem:[#allocation2 + $0x48] sm:$0xff] %vm692_vm12, %v2255_v42  ;;  %v791_v62 = vld [vmem:[#allocation2 + $0x10] sm:$0xff] }
  0xbd   : > { %703 = vst.msk [vmem:[#allocation2 + $0x50] sm:$0xff] %vm692_vm12, %v2255_v42  ;;  %v792_v0 = vld [vmem:[#allocation2 + $0x18] sm:$0xff] }
  0xbe   : > { %807 = vmax.xlane.f32.xlu0 %v774_v46  ;;  %704 = vst.msk [vmem:[#allocation2 + $0x58] sm:$0xff] %vm692_vm12, %v2255_v42  ;;  %v793_v55 = vld [vmem:[#allocation2 + $0x20] sm:$0xff] }
  0xbf   : > { %705 = vst.msk [vmem:[#allocation2 + $0x60] sm:$0xff] %vm692_vm12, %v2255_v42  ;;  %v2554_v59 = vld [vmem:[#allocation2 + $0x28] sm:$0xff] }
  0xc0   : > { %706 = vst.msk [vmem:[#allocation2 + $0x68] sm:$0xff] %vm692_vm12, %v2255_v42  ;;  %v2583_v8 = vld [vmem:[#allocation2 + $0x30] sm:$0xff] }
  0xc1   : > { %707 = vst.msk [vmem:[#allocation2 + $0x70] sm:$0xff] %vm692_vm12, %v2255_v42  ;;  %v2594_v14 = vld [vmem:[#allocation2 + $0x38] sm:$0xff] }
  0xc2   : > { %708 = vst.msk [vmem:[#allocation2 + $0x78] sm:$0xff] %vm692_vm12, %v2255_v42  ;;  %v2578_v3 = vld [vmem:[#allocation2 + $0x40] sm:$0xff] }
  0xc3   : > { %821 = vmax.xlane.f32.xlu2 %v2255_v42  ;;  %819 = vmax.xlane.f32.xlu1 %v2255_v42  ;;  %709 = vst.msk [vmem:[#allocation3] sm:$0xff] %vm692_vm12, %v2256_v47  ;;  %v2605_v29 = vld [vmem:[#allocation2 + $0x48] sm:$0xff] }
  0xc4   : > { %710 = vst.msk [vmem:[#allocation3 + $0x8] sm:$0xff] %vm692_vm12, %v2256_v47 }
  0xc5   : > { %711 = vst.msk [vmem:[#allocation3 + $0x10] sm:$0xff] %vm692_vm12, %v2256_v47  ;;  %v2598_v15 = vld [vmem:[#allocation2 + $0x58] sm:$0xff] }
  0xc6   : > { %817 = vmax.xlane.f32.xlu0 %v2255_v42  ;;  %712 = vst.msk [vmem:[#allocation3 + $0x18] sm:$0xff] %vm692_vm12, %v2256_v47  ;;  %v2623_v40 = vld [vmem:[#allocation2 + $0x60] sm:$0xff] }
  0xc7   : > { %713 = vst.msk [vmem:[#allocation3 + $0x20] sm:$0xff] %vm692_vm12, %v2256_v47 }
  0xc8   : > { %714 = vst.msk [vmem:[#allocation3 + $0x28] sm:$0xff] %vm692_vm12, %v2256_v47  ;;  %v2621_v36 = vld [vmem:[#allocation2 + $0x70] sm:$0xff] }
  0xc9   : > { %715 = vst.msk [vmem:[#allocation3 + $0x30] sm:$0xff] %vm692_vm12, %v2256_v47 }
  0xca   : > { %716 = vst.msk [vmem:[#allocation3 + $0x38] sm:$0xff] %vm692_vm12, %v2256_v47 }
  0xcb   : > { %827 = vmax.xlane.f32.xlu2 %v2255_v42  ;;  %825 = vmax.xlane.f32.xlu1 %v2255_v42  ;;  %717 = vst.msk [vmem:[#allocation3 + $0x40] sm:$0xff] %vm692_vm12, %v2256_v47 }
  0xcc   : > { %718 = vst.msk [vmem:[#allocation3 + $0x48] sm:$0xff] %vm692_vm12, %v2256_v47 }
  0xcd   : > { %719 = vst.msk [vmem:[#allocation3 + $0x50] sm:$0xff] %vm692_vm12, %v2256_v47  ;;  %v1016_v44 = vld [vmem:[#allocation3 + $0x18] sm:$0xff] }
  0xce   : > { %823 = vmax.xlane.f32.xlu0 %v2255_v42  ;;  %720 = vst.msk [vmem:[#allocation3 + $0x58] sm:$0xff] %vm692_vm12, %v2256_v47 }
  0xcf   : > { %721 = vst.msk [vmem:[#allocation3 + $0x60] sm:$0xff] %vm692_vm12, %v2256_v47 }
  0xd0   : > { %722 = vst.msk [vmem:[#allocation3 + $0x68] sm:$0xff] %vm692_vm12, %v2256_v47 }
  0xd1   : > { %723 = vst.msk [vmem:[#allocation3 + $0x70] sm:$0xff] %vm692_vm12, %v2256_v47 }
  0xd2   : > { %724 = vst.msk [vmem:[#allocation3 + $0x78] sm:$0xff] %vm692_vm12, %v2256_v47 }
  0xd3   : > { %833 = vmax.xlane.f32.xlu2 %v2255_v42  ;;  %831 = vmax.xlane.f32.xlu1 %v2255_v42  ;;  %725 = vst.msk [vmem:[%s3113_s5] sm:$0xff] %vm692_vm12, %v2256_v47 }
  0xd4   : > { %726 = vst.msk [vmem:[%s3113_s5 + $0x8] sm:$0xff] %vm692_vm12, %v2256_v47 }
  0xd5   : > { %727 = vst.msk [vmem:[%s3113_s5 + $0x10] sm:$0xff] %vm692_vm12, %v2256_v47  ;;  %v1024_v45 = vld [vmem:[#allocation3 + $0x58] sm:$0xff] }
  0xd6   : > { %829 = vmax.xlane.f32.xlu0 %v2255_v42  ;;  %728 = vst.msk [vmem:[%s3113_s5 + $0x18] sm:$0xff] %vm692_vm12, %v2256_v47 }
  0xd7   : > { %729 = vst.msk [vmem:[%s3113_s5 + $0x20] sm:$0xff] %vm692_vm12, %v2256_v47 }
  0xd8   : > { %730 = vst.msk [vmem:[%s3113_s5 + $0x28] sm:$0xff] %vm692_vm12, %v2256_v47 }
  0xd9   : > { %731 = vst.msk [vmem:[%s3113_s5 + $0x30] sm:$0xff] %vm692_vm12, %v2256_v47 }
  0xda   : > { %732 = vst.msk [vmem:[%s3113_s5 + $0x38] sm:$0xff] %vm692_vm12, %v2256_v47 }
  0xdb   : > { %1099 = vadd.xlane.f32.xlu2 %v2256_v47  ;;  %1101 = vadd.xlane.f32.xlu1 %v2256_v47  ;;  %733 = vst.msk [vmem:[%s3113_s5 + $0x40] sm:$0xff] %vm692_vm12, %v2256_v47 }
  0xdc   : > { %734 = vst.msk [vmem:[%s3113_s5 + $0x48] sm:$0xff] %vm692_vm12, %v2256_v47 }
  0xdd   : > { %735 = vst.msk [vmem:[%s3113_s5 + $0x50] sm:$0xff] %vm692_vm12, %v2256_v47 }
  0xde   : > { %835 = vmax.xlane.f32.xlu0 %v2255_v42  ;;  %736 = vst.msk [vmem:[%s3113_s5 + $0x58] sm:$0xff] %vm692_vm12, %v2256_v47 }
  0xdf   : > { %737 = vst.msk [vmem:[%s3113_s5 + $0x60] sm:$0xff] %vm692_vm12, %v2256_v47 }
  0xe0   : > { %738 = vst.msk [vmem:[%s3113_s5 + $0x68] sm:$0xff] %vm692_vm12, %v2256_v47 }
  0xe1   : > { %739 = vst.msk [vmem:[%s3113_s5 + $0x70] sm:$0xff] %vm692_vm12, %v2256_v47 }
  0xe2   : > { %740 = vst.msk [vmem:[%s3113_s5 + $0x78] sm:$0xff] %vm692_vm12, %v2256_v47 }
  0xe6   : > { %1097 = vadd.xlane.f32.xlu0 %v2256_v47 }
  0xee   : > { %1103 = vadd.xlane.f32.xlu0 %v2256_v47 }
  0xf6   : > { %1105 = vadd.xlane.f32.xlu0 %v2256_v47 }
  0xfe   : > { %1107 = vadd.xlane.f32.xlu0 %v2256_v47 }
 0x106   : > { %1109 = vadd.xlane.f32.xlu0 %v2256_v47 }
 0x10e   : > { %1111 = vadd.xlane.f32.xlu0 %v2256_v47 }
 0x116   : > { %1117 = vadd.xlane.f32.xlu0 %v2256_v47 }
 0x11e   : > { %1123 = vadd.xlane.f32.xlu0 %v2256_v47 }
 0x126   : > { %v814_v49 = vpop.xlane.xlu2 %813  ;;  %v810_v50 = vpop.xlane.xlu1 %809  ;;  %1226 = vadd.xlane.f32.xlu0 %v2256_v47 }
 0x127   : > { %v841_v61 = vmax.f32 %v793_v55, %v814_v49  ;;  %v839_v4 = vmax.f32 %v791_v62, %v810_v50 }
 0x129   : > { %v806_v52 = vpop.xlane.xlu0 %805  ;;  %1162 = vst.msk [vmem:[#allocation2 + $0x20] sm:$0xff] %vm692_vm12, %v841_v61  ;;  %v1033_v13 = vsub.f32 %v793_v55, %v841_v61  ;;  %v1031_v37 = vsub.f32 %v791_v62, %v839_v4 }
 0x12a   : > { %v2514_v53 = vmax.f32 %v2496_v51, %v806_v52  ;;  %1160 = vst.msk [vmem:[#allocation2 + $0x10] sm:$0xff] %vm692_vm12, %v839_v4  ;;  %v2641_v4 = vld [vmem:[#allocation2 + $0x78] sm:$0xff] }
 0x12b   : > { %v1053_v28 = vmul.f32 1.442695, %v1033_v13  ;;  %v1049_v48 = vmul.f32 1.442695, %v1031_v37 }
 0x12c   : > { %v1029_v54 = vsub.f32 %v2496_v51, %v2514_v53  ;;  %1158 = vst.msk [vmem:[#allocation2] sm:$0xff] %vm692_vm12, %v2514_v53  ;;  %855 = vperm.xlu1 %2149, %v2514_v53   ;;  %v1184_v51 = vld [vmem:[%s3113_s5 + $0x50] sm:$0xff] }
 0x12e   : > { %v816_v56 = vpop.xlane.xlu2 %815  ;;  %v812_v57 = vpop.xlane.xlu1 %811  ;;  %1232 = vadd.xlane.f32.xlu0 %v2256_v47 }
 0x12f   : > { %v2571_v1 = vmax.f32 %v2554_v59, %v816_v56  ;;  %v840_v5 = vmax.f32 %v792_v0, %v812_v57  ;;  %v1017_v56 = vld [vmem:[#allocation3 + $0x20] sm:$0xff] }
 0x131   : > { %v808_v60 = vpop.xlane.xlu0 %807  ;;  %1163 = vst.msk [vmem:[#allocation2 + $0x28] sm:$0xff] %vm692_vm12, %v2571_v1  ;;  %v1032_v12 = vsub.f32 %v792_v0, %v840_v5  ;;  %v1034_v61 = vsub.f32 %v2554_v59, %v2571_v1  ;;  %v1015_v1 = vld [vmem:[#allocation3 + $0x10] sm:$0xff] }
 0x132   : > { %v2567_v63 = vmax.f32 %v2547_v58, %v808_v60  ;;  %1161 = vst.msk [vmem:[#allocation2 + $0x18] sm:$0xff] %vm692_vm12, %v840_v5 }
 0x133   : > { %v1051_v19 = vmul.f32 1.442695, %v1032_v12 }
 0x134   : > { %v1030_v2 = vsub.f32 %v2547_v58, %v2567_v63  ;;  %1159 = vst.msk [vmem:[#allocation2 + $0x8] sm:$0xff] %vm692_vm12, %v2567_v63  ;;  %860 = vperm.xlu2 %2150, %v2567_v63  }
 0x135   : > { %2152 = vpow2.f32 %v1051_v19 }
 0x136   : > { %v822_v6 = vpop.xlane.xlu2 %821  ;;  %v820_v7 = vpop.xlane.xlu1 %819  ;;  %2154 = vpow2.f32 %v1053_v28 }
 0x137   : > { %v2586_v9 = vmax.f32 %v2578_v3, %v822_v6  ;;  %v2601_v17 = vmax.f32 %v2594_v14, %v820_v7  ;;  %2156 = vpow2.f32 %v1049_v48  ;;  %v2643_v7 = vld [vmem:[#allocation2 + $0x50] sm:$0xff] }
 0x139   : > { %v818_v10 = vpop.xlane.xlu0 %817  ;;  %1166 = vst.msk [vmem:[#allocation2 + $0x40] sm:$0xff] %vm692_vm12, %v2586_v9 }
 0x13a   : > { %v2592_v11 = vmax.f32 %v2583_v8, %v818_v10  ;;  %1165 = vst.msk [vmem:[#allocation2 + $0x38] sm:$0xff] %vm692_vm12, %v2601_v17  ;;  %v1055_v10 = vmul.f32 1.442695, %v1034_v61 }
 0x13b   : > { %v2153_v42 = vpop.eup %2152 }
 0x13c   : > { %1164 = vst.msk [vmem:[#allocation2 + $0x30] sm:$0xff] %vm692_vm12, %v2592_v11  ;;  %v2155_v46 = vpop.eup %2154  ;;  %v1080_v55 = vmul.f32 %v2153_v42, %v1016_v44  ;;  %2158 = vpow2.f32 %v1055_v10 }
 0x13d   : > { %v1081_v60 = vmul.f32 %v2155_v46, %v1017_v56  ;;  %v2157_v59 = vpop.eup %2156  ;;  %v1018_v56 = vld [vmem:[#allocation3 + $0x28] sm:$0xff] }
 0x13e   : > { %v828_v18 = vpop.xlane.xlu2 %827  ;;  %v826_v27 = vpop.xlane.xlu1 %825 }
 0x13f   : > { %v2608_v31 = vmax.f32 %v2598_v15, %v828_v18  ;;  %v2647_v13 = vmax.f32 %v2643_v7, %v826_v27  ;;  %v1035_v27 = vsub.f32 %v2583_v8, %v2592_v11  ;;  %v1036_v11 = vsub.f32 %v2594_v14, %v2601_v17 }
 0x141   : > { %v824_v32 = vpop.xlane.xlu0 %823  ;;  %v1040_v33 = vsub.f32 %v2598_v15, %v2608_v31  ;;  %1169 = vst.msk [vmem:[#allocation2 + $0x58] sm:$0xff] %vm692_vm12, %v2608_v31  ;;  %v1039_v19 = vsub.f32 %v2643_v7, %v2647_v13  ;;  %v1057_v42 = vmul.f32 1.442695, %v1035_v27  ;;  %v1023_v7 = vld [vmem:[#allocation3 + $0x50] sm:$0xff] }
 0x142   : > { %v2615_v34 = vmax.f32 %v2605_v29, %v824_v32  ;;  %1168 = vst.msk [vmem:[#allocation2 + $0x50] sm:$0xff] %vm692_vm12, %v2647_v13  ;;  %v1079_v32 = vmul.f32 %v2157_v59, %v1015_v1  ;;  %v1037_v59 = vsub.f32 %v2578_v3, %v2586_v9 }
 0x143   : > { %v1065_v43 = vmul.f32 1.442695, %v1039_v19  ;;  %v1176_v19 = vld [vmem:[%s3113_s5 + $0x10] sm:$0xff] }
 0x144   : > { %v1038_v35 = vsub.f32 %v2605_v29, %v2615_v34  ;;  %1167 = vst.msk [vmem:[#allocation2 + $0x48] sm:$0xff] %vm692_vm12, %v2615_v34  ;;  %v1061_v17 = vmul.f32 1.442695, %v1037_v59  ;;  %v2091_v59 = vsel %vm2405_vm11, 1.0, %v2256_v47 }
 0x146   : > { %v834_v38 = vpop.xlane.xlu2 %833  ;;  %v832_v39 = vpop.xlane.xlu1 %831 }
 0x147   : > { %v2626_v41 = vmax.f32 %v2621_v36, %v834_v38  ;;  %v2664_v38 = vld [vmem:[#allocation2 + $0x68] sm:$0xff] }
 0x148   : > { %v2667_v46 = vmax.f32 %v2664_v38, %v832_v39 }
 0x149   : > { %v830_v49 = vpop.xlane.xlu0 %829  ;;  %v1043_v50 = vsub.f32 %v2621_v36, %v2626_v41  ;;  %1172 = vst.msk [vmem:[#allocation2 + $0x70] sm:$0xff] %vm692_vm12, %v2626_v41  ;;  %v1027_v36 = vld [vmem:[#allocation3 + $0x70] sm:$0xff] }
 0x14a   : > { %v2633_v52 = vmax.f32 %v2623_v40, %v830_v49  ;;  %v1042_v8 = vsub.f32 %v2664_v38, %v2667_v46  ;;  %1171 = vst.msk [vmem:[#allocation2 + $0x68] sm:$0xff] %vm692_vm12, %v2667_v46 }
 0x14c   : > { %v1041_v57 = vsub.f32 %v2623_v40, %v2633_v52  ;;  %1170 = vst.msk [vmem:[#allocation2 + $0x60] sm:$0xff] %vm692_vm12, %v2633_v52  ;;  %v1025_v52 = vld [vmem:[#allocation3 + $0x60] sm:$0xff]  ;;  %v1071_v31 = vmul.f32 1.442695, %v1042_v8 }
 0x14e   : > { %v1100_v62 = vpop.xlane.xlu2 %1099  ;;  %v1102_v0 = vpop.xlane.xlu1 %1101 }
 0x14f   : > { %v1128_v5 = vadd.f32 %v1100_v62, %v1080_v55  ;;  %v1129_v6 = vadd.f32 %v1102_v0, %v1081_v60  ;;  %v2159_v55 = vpop.eup %2158  ;;  %v1059_v62 = vmul.f32 1.442695, %v1036_v11  ;;  %v1021_v11 = vld [vmem:[#allocation3 + $0x40] sm:$0xff] }
 0x150   : > { %v1082_v39 = vmul.f32 %v2159_v55, %v1018_v56 }
 0x151   : > { %v836_v12 = vpop.xlane.xlu0 %835  ;;  %1145 = vst.msk [vmem:[#allocation3 + $0x18] sm:$0xff] %vm692_vm12, %v1128_v5 }
 0x152   : > { %v2650_v18 = vmax.f32 %v2641_v4, %v836_v12  ;;  %1146 = vst.msk [vmem:[#allocation3 + $0x20] sm:$0xff] %vm692_vm12, %v1129_v6  ;;  %v1019_v12 = vld [vmem:[#allocation3 + $0x30] sm:$0xff] }
 0x154   : > { %v1044_v28 = vsub.f32 %v2641_v4, %v2650_v18  ;;  %1173 = vst.msk [vmem:[#allocation2 + $0x78] sm:$0xff] %vm692_vm12, %v2650_v18 }
 0x156   : > { %1115 = vadd.xlane.f32.xlu1 %v2256_v47 }
 0x158   : > { %v1292_v37 = vld [vmem:[#allocation3 + $0x18] sm:$0xff] }
 0x159   : > { %v1098_v44 = vpop.xlane.xlu0 %1097  ;;  %2160 = vlog2.f32 %v1292_v37  ;;  %v1293_v48 = vld [vmem:[#allocation3 + $0x20] sm:$0xff] }
 0x15a   : > { %v1127_v49 = vadd.f32 %v1098_v44, %v1079_v32  ;;  %2162 = vlog2.f32 %v1293_v48  ;;  %v1020_v44 = vld [vmem:[#allocation3 + $0x38] sm:$0xff] }
 0x15b   : > { %2164 = vpow2.f32 %v1057_v42 }
 0x15c   : > { %1144 = vst.msk [vmem:[#allocation3 + $0x10] sm:$0xff] %vm692_vm12, %v1127_v49 }
 0x15d   : > { %1113 = vadd.xlane.f32.xlu2 %v2256_v47 }
 0x15e   : > { %1121 = vadd.xlane.f32.xlu1 %v2256_v47 }
 0x15f   : > { %v2161_v60 = vpop.eup %2160 }
 0x160   : > { %v2163_v61 = vpop.eup %2162 }
 0x161   : > { %v1104_v0 = vpop.xlane.xlu0 %1103  ;;  %v2165_v6 = vpop.eup %2164 }
 0x162   : > { %v1130_v5 = vadd.f32 %v1104_v0, %v1082_v39  ;;  %v1083_v14 = vmul.f32 %v2165_v6, %v1019_v12  ;;  %v2090_v12 = vsel %vm2394_vm9, 1.0, %v2256_v47 }
 0x163   : > { %v1291_v10 = vld [vmem:[#allocation3 + $0x10] sm:$0xff] }
 0x164   : > { %2166 = vlog2.f32 %v1291_v10  ;;  %1147 = vst.msk [vmem:[#allocation3 + $0x28] sm:$0xff] %vm692_vm12, %v1130_v5  ;;  %v1063_v5 = vmul.f32 1.442695, %v1038_v35 }
 0x165   : > { %2168 = vpow2.f32 %v1059_v62  ;;  %1119 = vadd.xlane.f32.xlu2 %v2256_v47 }
 0x166   : > { %1224 = vadd.xlane.f32.xlu1 %v2091_v59 }
 0x169   : > { %v1106_v1 = vpop.xlane.xlu0 %1105 }
 0x16a   : > { %v2167_v27 = vpop.eup %2166  ;;  %v1131_v32 = vadd.f32 %v1106_v1, %v1083_v14  ;;  %v1069_v14 = vmul.f32 1.442695, %v1041_v57 }
 0x16b   : > { %v2169_v37 = vpop.eup %2168  ;;  %v1294_v42 = vld [vmem:[#allocation3 + $0x28] sm:$0xff] }
 0x16c   : > { %2170 = vlog2.f32 %v1294_v42  ;;  %1148 = vst.msk [vmem:[#allocation3 + $0x30] sm:$0xff] %vm692_vm12, %v1131_v32  ;;  %v1084_v48 = vmul.f32 %v2169_v37, %v1020_v44  ;;  %v1075_v32 = vmul.f32 1.442695, %v1044_v28  ;;  %v1028_v28 = vld [vmem:[#allocation3 + $0x78] sm:$0xff] }
 0x16d   : > { %2172 = vpow2.f32 %v1061_v17  ;;  %1222 = vadd.xlane.f32.xlu2 %v2090_v12  ;;  %v1022_v17 = vld [vmem:[#allocation3 + $0x48] sm:$0xff] }
 0x16e   : > { %1230 = vadd.xlane.f32.xlu1 %v2256_v47 }
 0x171   : > { %v1108_v49 = vpop.xlane.xlu0 %1107 }
 0x172   : > { %v2171_v55 = vpop.eup %2170  ;;  %v1132_v56 = vadd.f32 %v1108_v49, %v1084_v48 }
 0x173   : > { %v2173_v3 = vpop.eup %2172  ;;  %v1295_v9 = vld [vmem:[#allocation3 + $0x30] sm:$0xff] }
 0x174   : > { %2174 = vlog2.f32 %v1295_v9  ;;  %1149 = vst.msk [vmem:[#allocation3 + $0x38] sm:$0xff] %vm692_vm12, %v1132_v56  ;;  %v1085_v39 = vmul.f32 %v2173_v3, %v1021_v11 }
 0x175   : > { %1228 = vadd.xlane.f32.xlu2 %v2256_v47 }
 0x176   : > { %1236 = vadd.xlane.f32.xlu1 %v2256_v47 }
 0x179   : > { %v1110_v60 = vpop.xlane.xlu0 %1109 }
 0x17a   : > { %v2175_v61 = vpop.eup %2174  ;;  %v1133_v62 = vadd.f32 %v1110_v60, %v1085_v39 }
 0x17b   : > { %v1296_v0 = vld [vmem:[#allocation3 + $0x38] sm:$0xff] }
 0x17c   : > { %2176 = vlog2.f32 %v1296_v0  ;;  %1150 = vst.msk [vmem:[#allocation3 + $0x40] sm:$0xff] %vm692_vm12, %v1133_v62 }
 0x17d   : > { %1234 = vadd.xlane.f32.xlu2 %v2256_v47 }
 0x17e   : > { %1242 = vadd.xlane.f32.xlu1 %v2256_v47 }
 0x181   : > { %v1112_v35 = vpop.xlane.xlu0 %1111 }
 0x182   : > { %v2177_v6 = vpop.eup %2176 }
 0x183   : > { %v1297_v10 = vld [vmem:[#allocation3 + $0x40] sm:$0xff] }
 0x184   : > { %2178 = vlog2.f32 %v1297_v10 }
 0x185   : > { %2180 = vpow2.f32 %v1063_v5  ;;  %1240 = vadd.xlane.f32.xlu2 %v2256_v47 }
 0x186   : > { %2182 = vpow2.f32 %v1069_v14  ;;  %1248 = vadd.xlane.f32.xlu1 %v2256_v47 }
 0x187   : > { %2184 = vpow2.f32 %v1075_v32 }
 0x189   : > { %v1118_v40 = vpop.xlane.xlu0 %1117 }
 0x18a   : > { %v2179_v29 = vpop.eup %2178 }
 0x18b   : > { %v2181_v34 = vpop.eup %2180 }
 0x18c   : > { %v1086_v1 = vmul.f32 %v2181_v34, %v1022_v17  ;;  %v2183_v37 = vpop.eup %2182  ;;  %v1067_v34 = vmul.f32 1.442695, %v1040_v33 }
 0x18d   : > { %v1089_v57 = vmul.f32 %v2183_v37, %v1025_v52  ;;  %v2185_v49 = vpop.eup %2184  ;;  %1246 = vadd.xlane.f32.xlu2 %v2256_v47 }
 0x18e   : > { %v1134_v27 = vadd.f32 %v1112_v35, %v1086_v1  ;;  %v861_v48 = vpop.permute.xlu2 %860  ;;  %v1092_v56 = vmul.f32 %v2185_v49, %v1028_v28  ;;  %v1073_v35 = vmul.f32 1.442695, %v1043_v50 }
 0x18f   : > { %v1137_v42 = vadd.f32 %v1118_v40, %v1089_v57  ;;  %v934_v4 = vsub.f32 %v2387_v30, %v861_v48  ;;  %v1026_v57 = vld [vmem:[#allocation3 + $0x68] sm:$0xff] }
 0x190   : > { %1151 = vst.msk [vmem:[#allocation3 + $0x48] sm:$0xff] %vm692_vm12, %v1134_v27 }
 0x191   : > { %1154 = vst.msk [vmem:[#allocation3 + $0x60] sm:$0xff] %vm692_vm12, %v1137_v42  ;;  %v1124_v18 = vpop.xlane.xlu0 %1123  ;;  %v950_v60 = vmin.f32 %v934_v4, 0.0  ;;  %v1179_v42 = vld [vmem:[%s3113_s5 + $0x28] sm:$0xff] }
 0x192   : > { %v1140_v11 = vadd.f32 %v1124_v18, %v1092_v56 }
 0x193   : > { %v967_v0 = vmul.f32 1.442695, %v950_v60  ;;  %v1174_v60 = vld [vmem:[%s3113_s5] sm:$0xff] }
 0x194   : > { %1157 = vst.msk [vmem:[#allocation3 + $0x78] sm:$0xff] %vm692_vm12, %v1140_v11 }
 0x195   : > { %1252 = vadd.xlane.f32.xlu2 %v2256_v47 }
 0x197   : > { %v1298_v44 = vld [vmem:[#allocation3 + $0x48] sm:$0xff] }
 0x198   : > { %2186 = vlog2.f32 %v1298_v44  ;;  %v1301_v61 = vld [vmem:[#allocation3 + $0x60] sm:$0xff] }
 0x199   : > { %2188 = vlog2.f32 %v1301_v61  ;;  %v1227_v50 = vpop.xlane.xlu0 %1226 }
 0x19a   : > { %v1256_v38 = vadd.f32 %v1227_v50, %v1176_v19  ;;  %v1047_v50 = vmul.f32 1.442695, %v1030_v2  ;;  %v1187_v2 = vld [vmem:[%s3113_s5 + $0x68] sm:$0xff] }
 0x19b   : > { %v1304_v6 = vld [vmem:[#allocation3 + $0x78] sm:$0xff] }
 0x19c   : > { %1272 = vst.msk [vmem:[%s3113_s5 + $0x10] sm:$0xff] %vm692_vm12, %v1256_v38  ;;  %v1189_v38 = vld [vmem:[%s3113_s5 + $0x78] sm:$0xff] }
 0x19e   : > { %v856_v55 = vpop.permute.xlu1 %855  ;;  %v2187_v9 = vpop.eup %2186 }
 0x19f   : > { %v933_v3 = vsub.f32 %v2385_v26, %v856_v55  ;;  %v2189_v5 = vpop.eup %2188 }
 0x1a1   : > { %v949_v39 = vmin.f32 %v933_v3, 0.0  ;;  %v1233_v48 = vpop.xlane.xlu0 %1232 }
 0x1a2   : > { %v1259_v4 = vadd.f32 %v1233_v48, %v1179_v42 }
 0x1a3   : > { %v965_v62 = vmul.f32 1.442695, %v949_v39 }
 0x1a4   : > { %1275 = vst.msk [vmem:[%s3113_s5 + $0x28] sm:$0xff] %vm692_vm12, %v1259_v4  ;;  %v1182_v4 = vld [vmem:[%s3113_s5 + $0x40] sm:$0xff] }
 0x1a5   : > { %2190 = vpow2.f32 %v965_v62 }
 0x1a6   : > { %2192 = vpow2.f32 %v967_v0  ;;  %v1177_v0 = vld [vmem:[%s3113_s5 + $0x18] sm:$0xff] }
 0x1a7   : > { %2194 = vlog2.f32 %v1304_v6  ;;  %v1175_v6 = vld [vmem:[%s3113_s5 + $0x8] sm:$0xff] }
 0x1a8   : > { %2196 = vpow2.f32 %v1067_v34  ;;  %v1178_v34 = vld [vmem:[%s3113_s5 + $0x20] sm:$0xff] }
 0x1a9   : > { %2198 = vpow2.f32 %v1065_v43 }
 0x1aa   : > { %2200 = vpow2.f32 %v1073_v35 }
 0x1ab   : > { %v2191_v10 = vpop.eup %2190  ;;  %2202 = vpow2.f32 %v1071_v31 }
 0x1ac   : > { %v997_v12 = vsel %vm2394_vm9, %v2191_v10, 0.0  ;;  %v2193_v59 = vpop.eup %2192 }
 0x1ad   : > { %1093 = vadd.xlane.f32.xlu0 %v997_v12  ;;  %v2195_v14 = vpop.eup %2194  ;;  %v998_v29 = vsel %vm2405_vm11, %v2193_v59, 0.0 }
 0x1ae   : > { %v2197_v17 = vpop.eup %2196  ;;  %v1180_v14 = vld [vmem:[%s3113_s5 + $0x30] sm:$0xff] }
 0x1af   : > { %v1088_v1 = vmul.f32 %v2197_v17, %v1024_v45  ;;  %v2199_v27 = vpop.eup %2198  ;;  %v1183_v45 = vld [vmem:[%s3113_s5 + $0x48] sm:$0xff] }
 0x1b0   : > { %v2201_v13 = vpop.eup %2200  ;;  %v1087_v41 = vmul.f32 %v2199_v27, %v1023_v7  ;;  %v1045_v7 = vmul.f32 1.442695, %v1029_v54 }
 0x1b1   : > { %v1091_v37 = vmul.f32 %v2201_v13, %v1027_v36  ;;  %v2203_v52 = vpop.eup %2202  ;;  %v1186_v13 = vld [vmem:[%s3113_s5 + $0x60] sm:$0xff] }
 0x1b2   : > { %v1090_v44 = vmul.f32 %v2203_v52, %v1026_v57  ;;  %v1014_v57 = vld [vmem:[#allocation3 + $0x8] sm:$0xff] }
 0x1b5   : > { %1095 = vadd.xlane.f32.xlu0 %v998_v29 }
 0x1bd   : > { %1238 = vadd.xlane.f32.xlu0 %v2256_v47 }
 0x1c5   : > { %1244 = vadd.xlane.f32.xlu0 %v2256_v47 }
 0x1c9   : > { %v1116_v15 = vpop.xlane.xlu1 %1115 }
 0x1ca   : > { %v1136_v33 = vadd.f32 %v1116_v15, %v1088_v1  ;;  %v1181_v15 = vld [vmem:[%s3113_s5 + $0x38] sm:$0xff] }
 0x1cc   : > { %1153 = vst.msk [vmem:[#allocation3 + $0x58] sm:$0xff] %vm692_vm12, %v1136_v33 }
 0x1cd   : > { %1250 = vadd.xlane.f32.xlu0 %v2256_v47 }
 0x1d0   : > { %v1114_v32 = vpop.xlane.xlu2 %1113 }
 0x1d1   : > { %v1135_v46 = vadd.f32 %v1114_v32, %v1087_v41  ;;  %v1122_v8 = vpop.xlane.xlu1 %1121  ;;  %v1013_v32 = vld [vmem:[#allocation3] sm:$0xff] }
 0x1d2   : > { %v1139_v40 = vadd.f32 %v1122_v8, %v1091_v37 }
 0x1d3   : > { %v1300_v47 = vld [vmem:[#allocation3 + $0x58] sm:$0xff]  ;;  %1152 = vst.msk [vmem:[#allocation3 + $0x50] sm:$0xff] %vm692_vm12, %v1135_v46 }
 0x1d4   : > { %2204 = vlog2.f32 %v1300_v47  ;;  %1156 = vst.msk [vmem:[#allocation3 + $0x70] sm:$0xff] %vm692_vm12, %v1139_v40 }
 0x1d8   : > { %v1120_v49 = vpop.xlane.xlu2 %1119 }
 0x1d9   : > { %v1138_v18 = vadd.f32 %v1120_v49, %v1090_v44  ;;  %v1225_v10 = vpop.xlane.xlu1 %1224 }
 0x1da   : > { %v2205_v28 = vpop.eup %2204  ;;  %v1299_v55 = vld [vmem:[#allocation3 + $0x50] sm:$0xff]  ;;  %v1255_v59 = vadd.f32 %v1225_v10, %v1175_v6  ;;  %v1322_v6 = vld [vmem:[#allocation2 + $0x8] sm:$0xff] }
 0x1db   : > { %2206 = vlog2.f32 %v1299_v55  ;;  %v1303_v56 = vld [vmem:[#allocation3 + $0x70] sm:$0xff]  ;;  %1155 = vst.msk [vmem:[#allocation3 + $0x68] sm:$0xff] %vm692_vm12, %v1138_v18 }
 0x1dc   : > { %2208 = vlog2.f32 %v1303_v56  ;;  %1271 = vst.msk [vmem:[%s3113_s5 + $0x8] sm:$0xff] %vm692_vm12, %v1255_v59  ;;  %v1188_v59 = vld [vmem:[%s3113_s5 + $0x70] sm:$0xff] }
 0x1e0   : > { %v1223_v61 = vpop.xlane.xlu2 %1222 }
 0x1e1   : > { %v2207_v3 = vpop.eup %2206  ;;  %v1254_v62 = vadd.f32 %v1223_v61, %v1174_v60  ;;  %v1231_v43 = vpop.xlane.xlu1 %1230  ;;  %v1185_v60 = vld [vmem:[%s3113_s5 + $0x58] sm:$0xff] }
 0x1e2   : > { %v2209_v9 = vpop.eup %2208  ;;  %v1302_v11 = vld [vmem:[#allocation3 + $0x68] sm:$0xff]  ;;  %v1258_v17 = vadd.f32 %v1231_v43, %v1178_v34 }
 0x1e3   : > { %2210 = vlog2.f32 %v1302_v11  ;;  %1270 = vst.msk [vmem:[%s3113_s5] sm:$0xff] %vm692_vm12, %v1254_v62  ;;  %v1321_v9 = vld [vmem:[#allocation2] sm:$0xff] }
 0x1e4   : > { %1274 = vst.msk [vmem:[%s3113_s5 + $0x20] sm:$0xff] %vm692_vm12, %v1258_v17  ;;  %2212 = vpow2.f32 %v1045_v7 }
 0x1e5   : > { %2214 = vpow2.f32 %v1047_v50 }
 0x1e8   : > { %v1229_v5 = vpop.xlane.xlu2 %1228 }
 0x1e9   : > { %v2211_v39 = vpop.eup %2210  ;;  %v1257_v12 = vadd.f32 %v1229_v5, %v1177_v0  ;;  %v1237_v31 = vpop.xlane.xlu1 %1236 }
 0x1ea   : > { %v1261_v27 = vadd.f32 %v1237_v31, %v1181_v15  ;;  %v2213_v19 = vpop.eup %2212 }
 0x1eb   : > { %1273 = vst.msk [vmem:[%s3113_s5 + $0x18] sm:$0xff] %vm692_vm12, %v1257_v12  ;;  %v1077_v37 = vmul.f32 %v2213_v19, %v1013_v32  ;;  %v2215_v52 = vpop.eup %2214 }
 0x1ec   : > { %1277 = vst.msk [vmem:[%s3113_s5 + $0x38] sm:$0xff] %vm692_vm12, %v1261_v27  ;;  %v1078_v42 = vmul.f32 %v2215_v52, %v1014_v57 }
 0x1f0   : > { %v1235_v29 = vpop.xlane.xlu2 %1234 }
 0x1f1   : > { %v1260_v35 = vadd.f32 %v1235_v29, %v1180_v14  ;;  %v1243_v53 = vpop.xlane.xlu1 %1242 }
 0x1f2   : > { %v1264_v41 = vadd.f32 %v1243_v53, %v1184_v51 }
 0x1f3   : > { %1276 = vst.msk [vmem:[%s3113_s5 + $0x30] sm:$0xff] %vm692_vm12, %v1260_v35 }
 0x1f4   : > { %1280 = vst.msk [vmem:[%s3113_s5 + $0x50] sm:$0xff] %vm692_vm12, %v1264_v41 }
 0x1f8   : > { %v1241_v1 = vpop.xlane.xlu2 %1240 }
 0x1f9   : > { %v1263_v33 = vadd.f32 %v1241_v1, %v1183_v45  ;;  %v1249_v40 = vpop.xlane.xlu1 %1248 }
 0x1fa   : > { %v1267_v47 = vadd.f32 %v1249_v40, %v1187_v2 }
 0x1fb   : > { %1279 = vst.msk [vmem:[%s3113_s5 + $0x48] sm:$0xff] %vm692_vm12, %v1263_v33 }
 0x1fc   : > { %1283 = vst.msk [vmem:[%s3113_s5 + $0x68] sm:$0xff] %vm692_vm12, %v1267_v47 }
 0x200   : > { %v1247_v36 = vpop.xlane.xlu2 %1246 }
 0x201   : > { %v1266_v54 = vadd.f32 %v1247_v36, %v1186_v13 }
 0x203   : > { %1282 = vst.msk [vmem:[%s3113_s5 + $0x60] sm:$0xff] %vm692_vm12, %v1266_v54 }
 0x208   : > { %v1253_v63 = vpop.xlane.xlu2 %1252 }
 0x209   : > { %v1269_v8 = vadd.f32 %v1253_v63, %v1189_v38 }
 0x20b   : > { %1285 = vst.msk [vmem:[%s3113_s5 + $0x78] sm:$0xff] %vm692_vm12, %v1269_v8 }
 0x220   : > { %v1094_v58 = vpop.xlane.xlu0 %1093 }
 0x221   : > { %v1125_v46 = vadd.f32 %v1094_v58, %v1077_v37 }
 0x223   : > { %1142 = vst.msk [vmem:[#allocation3] sm:$0xff] %vm692_vm12, %v1125_v46 }
 0x228   : > { %v1096_v44 = vpop.xlane.xlu0 %1095 }
 0x229   : > { %v1126_v48 = vadd.f32 %v1096_v44, %v1078_v42 }
 0x22a   : > { %v1289_v49 = vld [vmem:[#allocation3] sm:$0xff] }
 0x22b   : > { %2216 = vlog2.f32 %v1289_v49  ;;  %1143 = vst.msk [vmem:[#allocation3 + $0x8] sm:$0xff] %vm692_vm12, %v1126_v48  ;;  %vm1305_vm13 = vcmp.gt.f32.partialorder %v1289_v49, 0.0 }
 0x230   : > { %v1239_v18 = vpop.xlane.xlu0 %1238 }
 0x231   : > { %v2217_v28 = vpop.eup %2216  ;;  %v1262_v55 = vadd.f32 %v1239_v18, %v1182_v4 }
 0x232   : > { %v1338_v56 = vmul.f32 0.6931472, %v2217_v28  ;;  %v1290_v3 = vld [vmem:[#allocation3 + $0x8] sm:$0xff] }
 0x233   : > { %2218 = vlog2.f32 %v1290_v3  ;;  %1278 = vst.msk [vmem:[%s3113_s5 + $0x40] sm:$0xff] %vm692_vm12, %v1262_v55  ;;  %vm1306_vm14 = vcmp.gt.f32.partialorder %v1290_v3, 0.0 }
 0x234   : > { %v1369_v11 = vadd.f32 %v1338_v56, %v1321_v9 }
 0x236   : > { %v1385_v39 = vsel %vm1305_vm13, %v1369_v11, -3.4028235e+38 }
 0x237   : > { %1401 = vst.msk [vmem:[#allocation4] sm:$0xff] %vm692_vm12, %v1385_v39 }
 0x238   : > { %v1245_v61 = vpop.xlane.xlu0 %1244 }
 0x239   : > { %v2219_v62 = vpop.eup %2218  ;;  %v1265_v0 = vadd.f32 %v1245_v61, %v1185_v60 }
 0x23a   : > { %v1340_v5 = vmul.f32 0.6931472, %v2219_v62 }
 0x23b   : > { %1281 = vst.msk [vmem:[%s3113_s5 + $0x58] sm:$0xff] %vm692_vm12, %v1265_v0 }
 0x23c   : > { %v1370_v10 = vadd.f32 %v1340_v5, %v1322_v6 }
 0x23e   : > { %v1386_v12 = vsel %vm1306_vm14, %v1370_v10, -3.4028235e+38 }
 0x23f   : > { %1402 = vst.msk [vmem:[#allocation4 + $0x8] sm:$0xff] %vm692_vm12, %v1386_v12 }
 0x240   : > { %v1251_v14 = vpop.xlane.xlu0 %1250 }
 0x241   : > { %v1268_v29 = vadd.f32 %v1251_v14, %v1188_v59 }
 0x243   : > { %1284 = vst.msk [vmem:[%s3113_s5 + $0x70] sm:$0xff] %vm692_vm12, %v1268_v29 }
 0x244 PF: > { %p2092_p5 = scmp.ne.s32.totalorder %s2243_s18, 1 }
 0x246   : > { %1420 = sbr.rel (%p2092_p5) target bundleno = 868 (0x364), region = 52 }
 0x24b   : > { %v1554_v34 = vld [vmem:[#allocation4] sm:$0xff]  ;;  %v2258_v43 = vmov 0   ;;  %v2259_v35 = vmov 0.0   ;;  %v1555_v17 = vld [vmem:[#allocation4 + $0x8] sm:$0xff]  ;;  %v1506_v45 = vmul.f32 2.0, %v2358_v16  ;;  %v1507_v31 = vmul.f32 2.0, %v2363_v21 }
 0x24c   : > { %2220 = vset.pattern.permute.xlu0 %v2258_v43  ;;  %1852 = vadd.xlane.f32.xlu1 %v2259_v35  ;;  %vm1425_vm15 = vcmask 7168   ;;  %vm1442_vm0 = vcmp.eq.s32.totalorder %v2361_v20, %v2368_v23  ;;  %vm2260_vm3 = vmmov 1   ;;  %vm1443_vm8 = vcmp.eq.s32.totalorder %v2366_v22, %v2368_v23 }
 0x24d   : > { %1572 = vperm.xlu0 %2220, %v1554_v34   ;;  %1846 = vadd.xlane.f32.xlu2 %v2259_v35  ;;  %v1522_v1 = vmul.f32 %v1506_v45, %v1506_v45  ;;  %v1523_v13 = vmul.f32 %v1507_v31, %v1507_v31  ;;  %1431 = vst.msk [vmem:[%s3112_s4 + $0x28] sm:$0xff] %vm1425_vm15, %v2259_v35  ;;  %vm1458_vm4 = vmxor %vm1442_vm0, %vm2260_vm3 }
 0x24e   : > { %1426 = vst.msk [vmem:[%s3112_s4] sm:$0xff] %vm1425_vm15, %v2259_v35  ;;  %vm1474_vm7 = vmand %vm581_vm1, %vm1458_vm4 }
 0x24f   : > { %v1538_v15 = vsub.f32 %v2385_v26, %v1522_v1  ;;  %v2877_v53 = vsub.f32 %v2387_v30, %v1523_v13  ;;  %1427 = vst.msk [vmem:[%s3112_s4 + $0x8] sm:$0xff] %vm1425_vm15, %v2259_v35  ;;  %vm1490_vm1 = vmand %vm1474_vm7, %vm668_vm5 }
 0x250   : > { %1428 = vst.msk [vmem:[%s3112_s4 + $0x10] sm:$0xff] %vm1425_vm15, %v2259_v35  ;;  %vm2964_vm9 = vmxor %vm1443_vm8, %vm2260_vm3 }
 0x251   : > { %1429 = vst.msk [vmem:[%s3112_s4 + $0x18] sm:$0xff] %vm1425_vm15, %v2259_v35  ;;  %vm1475_vm5 = vmand %vm582_vm2, %vm2964_vm9 }
 0x252   : > { %1430 = vst.msk [vmem:[%s3112_s4 + $0x20] sm:$0xff] %vm1425_vm15, %v2259_v35  ;;  %vm1491_vm2 = vmand %vm1475_vm5, %vm669_vm6 }
 0x253   : > { %1432 = vst.msk [vmem:[%s3112_s4 + $0x30] sm:$0xff] %vm1425_vm15, %v2259_v35 }
 0x254   : > { %1856 = vadd.xlane.f32.xlu1 %v2259_v35  ;;  %v1831_v2 = vld [vmem:[%s3112_s4 + $0x28] sm:$0xff]  ;;  %1433 = vst.msk [vmem:[%s3112_s4 + $0x38] sm:$0xff] %vm1425_vm15, %v2259_v35 }
 0x255   : > { %1577 = vperm.xlu0 %2220, %v1555_v17   ;;  %1848 = vadd.xlane.f32.xlu2 %v2259_v35  ;;  %1434 = vst.msk [vmem:[%s3112_s4 + $0x40] sm:$0xff] %vm1425_vm15, %v2259_v35 }
 0x256   : > { %1435 = vst.msk [vmem:[%s3112_s4 + $0x48] sm:$0xff] %vm1425_vm15, %v2259_v35 }
 0x257   : > { %1436 = vst.msk [vmem:[%s3112_s4 + $0x50] sm:$0xff] %vm1425_vm15, %v2259_v35  ;;  %v1828_v16 = vld [vmem:[%s3112_s4 + $0x10] sm:$0xff] }
 0x258   : > { %1437 = vst.msk [vmem:[%s3112_s4 + $0x58] sm:$0xff] %vm1425_vm15, %v2259_v35  ;;  %v1829_v23 = vld [vmem:[%s3112_s4 + $0x18] sm:$0xff] }
 0x259   : > { %1438 = vst.msk [vmem:[%s3112_s4 + $0x60] sm:$0xff] %vm1425_vm15, %v2259_v35  ;;  %v1830_v1 = vld [vmem:[%s3112_s4 + $0x20] sm:$0xff] }
 0x25a   : > { %1439 = vst.msk [vmem:[%s3112_s4 + $0x68] sm:$0xff] %vm1425_vm15, %v2259_v35  ;;  %v1832_v48 = vld [vmem:[%s3112_s4 + $0x30] sm:$0xff] }
 0x25b   : > { %v1833_v42 = vld [vmem:[%s3112_s4 + $0x38] sm:$0xff]  ;;  %1440 = vst.msk [vmem:[%s3112_s4 + $0x70] sm:$0xff] %vm1425_vm15, %v2259_v35 }
 0x25c   : > { %1860 = vadd.xlane.f32.xlu1 %v2259_v35  ;;  %1441 = vst.msk [vmem:[%s3112_s4 + $0x78] sm:$0xff] %vm1425_vm15, %v2259_v35  ;;  %v1834_v25 = vld [vmem:[%s3112_s4 + $0x40] sm:$0xff] }
 0x25d   : > { %1854 = vadd.xlane.f32.xlu2 %v2259_v35  ;;  %v1835_v56 = vld [vmem:[%s3112_s4 + $0x48] sm:$0xff] }
 0x25e   : > { %v1836_v29 = vld [vmem:[%s3112_s4 + $0x50] sm:$0xff] }
 0x25f   : > { %v1837_v60 = vld [vmem:[%s3112_s4 + $0x58] sm:$0xff] }
 0x261   : > { %v1839_v10 = vld [vmem:[%s3112_s4 + $0x68] sm:$0xff] }
 0x262   : > { %v1840_v31 = vld [vmem:[%s3112_s4 + $0x70] sm:$0xff] }
 0x264   : > { %1864 = vadd.xlane.f32.xlu1 %v2259_v35 }
 0x265   : > { %1858 = vadd.xlane.f32.xlu2 %v2259_v35 }
 0x26c   : > { %1868 = vadd.xlane.f32.xlu1 %v2259_v35 }
 0x26d   : > { %1862 = vadd.xlane.f32.xlu2 %v2259_v35 }
 0x275   : > { %1866 = vadd.xlane.f32.xlu2 %v2259_v35 }
 0x27d   : > { %1870 = vadd.xlane.f32.xlu2 %v2259_v35 }
 0x27f   : > { %1850 = vadd.xlane.f32.xlu0 %v2259_v35 }
 0x2bf   : > { %v1573_v33 = vpop.permute.xlu0 %1572  ;;  %v1853_v38 = vpop.xlane.xlu1 %1852 }
 0x2c0   : > { %v1650_v27 = vmax.f32 %v1538_v15, %v1573_v33  ;;  %v1666_v7 = vmin.f32 %v1538_v15, %v1573_v33  ;;  %v1847_v58 = vpop.xlane.xlu2 %1846  ;;  %v1879_v47 = vadd.f32 %v1853_v38, %v1831_v2 }
 0x2c1   : > { %v1876_v44 = vadd.f32 %v1847_v58, %v1828_v16 }
 0x2c2   : > { %v1682_v36 = vsub.f32 %v1666_v7, %v1650_v27  ;;  %1896 = vst.msk [vmem:[%s3112_s4 + $0x28] sm:$0xff] %vm1425_vm15, %v1879_v47  ;;  %v1826_v7 = vld [vmem:[%s3112_s4] sm:$0xff] }
 0x2c3   : > { %1893 = vst.msk [vmem:[%s3112_s4 + $0x10] sm:$0xff] %vm1425_vm15, %v1876_v44 }
 0x2c4   : > { %v1698_v51 = vmul.f32 1.442695, %v1682_v36 }
 0x2c6   : > { %2221 = vpow2.f32 %v1698_v51  ;;  %v1827_v51 = vld [vmem:[%s3112_s4 + $0x8] sm:$0xff] }
 0x2c7   : > { %v1578_v54 = vpop.permute.xlu0 %1577  ;;  %v1857_v46 = vpop.xlane.xlu1 %1856 }
 0x2c8   : > { %v2880_v41 = vmax.f32 %v2877_v53, %v1578_v54  ;;  %v1667_v50 = vmin.f32 %v2877_v53, %v1578_v54  ;;  %v1849_v8 = vpop.xlane.xlu2 %1848  ;;  %v1881_v4 = vadd.f32 %v1857_v46, %v1833_v42 }
 0x2c9   : > { %v1877_v3 = vadd.f32 %v1849_v8, %v1829_v23 }
 0x2ca   : > { %v1683_v26 = vsub.f32 %v1667_v50, %v2880_v41  ;;  %1898 = vst.msk [vmem:[%s3112_s4 + $0x38] sm:$0xff] %vm1425_vm15, %v1881_v4 }
 0x2cb   : > { %1894 = vst.msk [vmem:[%s3112_s4 + $0x18] sm:$0xff] %vm1425_vm15, %v1877_v3 }
 0x2cc   : > { %v2222_v19 = vpop.eup %2221  ;;  %v1700_v32 = vmul.f32 1.442695, %v1683_v26 }
 0x2cd   : > { %v1730_v37 = vadd.f32 1.0, %v2222_v19 }
 0x2ce   : > { %2223 = vpow2.f32 %v1700_v32 }
 0x2cf   : > { %2225 = vlog2.f32 %v1730_v37  ;;  %v1861_v18 = vpop.xlane.xlu1 %1860 }
 0x2d0   : > { %v1855_v28 = vpop.xlane.xlu2 %1854  ;;  %v1883_v9 = vadd.f32 %v1861_v18, %v1835_v56 }
 0x2d1   : > { %v1880_v11 = vadd.f32 %v1855_v28, %v1832_v48 }
 0x2d2   : > { %1900 = vst.msk [vmem:[%s3112_s4 + $0x48] sm:$0xff] %vm1425_vm15, %v1883_v9 }
 0x2d3   : > { %1897 = vst.msk [vmem:[%s3112_s4 + $0x30] sm:$0xff] %vm1425_vm15, %v1880_v11 }
 0x2d4   : > { %v2224_v20 = vpop.eup %2223 }
 0x2d5   : > { %v2226_v30 = vpop.eup %2225  ;;  %v1731_v63 = vadd.f32 1.0, %v2224_v20 }
 0x2d6   : > { %v1747_v40 = vmul.f32 0.6931472, %v2226_v30 }
 0x2d7   : > { %2227 = vlog2.f32 %v1731_v63  ;;  %v1865_v62 = vpop.xlane.xlu1 %1864 }
 0x2d8   : > { %v1778_v52 = vadd.f32 %v1747_v40, %v1650_v27  ;;  %v1859_v0 = vpop.xlane.xlu2 %1858  ;;  %v1885_v5 = vadd.f32 %v1865_v62, %v1837_v60 }
 0x2d9   : > { %v1882_v6 = vadd.f32 %v1859_v0, %v1834_v25 }
 0x2da   : > { %v1794_v57 = vsub.f32 %v1778_v52, %v1538_v15  ;;  %1902 = vst.msk [vmem:[%s3112_s4 + $0x58] sm:$0xff] %vm1425_vm15, %v1885_v5 }
 0x2db   : > { %1899 = vst.msk [vmem:[%s3112_s4 + $0x40] sm:$0xff] %vm1425_vm15, %v1882_v6 }
 0x2dc   : > { %v1810_v24 = vsel %vm1490_vm1, %v1794_v57, 0.0 }
 0x2dd   : > { %v2228_v49 = vpop.eup %2227  ;;  %1842 = vadd.xlane.f32.xlu1 %v1810_v24 }
 0x2de   : > { %v1749_v55 = vmul.f32 0.6931472, %v2228_v49 }
 0x2df   : > { %v1869_v12 = vpop.xlane.xlu1 %1868 }
 0x2e0   : > { %v1779_v21 = vadd.f32 %v1749_v55, %v2880_v41  ;;  %v1887_v59 = vadd.f32 %v1869_v12, %v1839_v10  ;;  %v1863_v14 = vpop.xlane.xlu2 %1862  ;;  %v1841_v41 = vld [vmem:[%s3112_s4 + $0x78] sm:$0xff] }
 0x2e1   : > { %v1884_v34 = vadd.f32 %v1863_v14, %v1836_v29 }
 0x2e2   : > { %v1795_v39 = vsub.f32 %v1779_v21, %v2877_v53  ;;  %1904 = vst.msk [vmem:[%s3112_s4 + $0x68] sm:$0xff] %vm1425_vm15, %v1887_v59 }
 0x2e3   : > { %1901 = vst.msk [vmem:[%s3112_s4 + $0x50] sm:$0xff] %vm1425_vm15, %v1884_v34 }
 0x2e4   : > { %v1811_v61 = vsel %vm1491_vm2, %v1795_v39, 0.0 }
 0x2e5   : > { %1844 = vadd.xlane.f32.xlu1 %v1811_v61 }
 0x2e8   : > { %v1867_v43 = vpop.xlane.xlu2 %1866 }
 0x2ed   : > { %1872 = vadd.xlane.f32.xlu1 %v2259_v35  ;;  %v1838_v35 = vld [vmem:[%s3112_s4 + $0x60] sm:$0xff] }
 0x2ee   : > { %v1886_v17 = vadd.f32 %v1867_v43, %v1838_v35 }
 0x2f0   : > { %1903 = vst.msk [vmem:[%s3112_s4 + $0x60] sm:$0xff] %vm1425_vm15, %v1886_v17  ;;  %v1871_v15 = vpop.xlane.xlu2 %1870 }
 0x2f1   : > { %v1888_v27 = vadd.f32 %v1871_v15, %v1840_v31 }
 0x2f2   : > { %v1851_v45 = vpop.xlane.xlu0 %1850 }
 0x2f3   : > { %v1878_v33 = vadd.f32 %v1851_v45, %v1830_v1  ;;  %1905 = vst.msk [vmem:[%s3112_s4 + $0x70] sm:$0xff] %vm1425_vm15, %v1888_v27 }
 0x2f5   : > { %1895 = vst.msk [vmem:[%s3112_s4 + $0x20] sm:$0xff] %vm1425_vm15, %v1878_v33 }
 0x350   : > { %v1843_v13 = vpop.xlane.xlu1 %1842 }
 0x351   : > { %v1874_v36 = vadd.f32 %v1843_v13, %v1826_v7 }
 0x353   : > { %1891 = vst.msk [vmem:[%s3112_s4] sm:$0xff] %vm1425_vm15, %v1874_v36 }
 0x358   : > { %v1845_v53 = vpop.xlane.xlu1 %1844 }
 0x359   : > { %v1875_v54 = vadd.f32 %v1845_v53, %v1827_v51 }
 0x35b   : > { %1892 = vst.msk [vmem:[%s3112_s4 + $0x8] sm:$0xff] %vm1425_vm15, %v1875_v54 }
 0x360   : > { %v1873_v50 = vpop.xlane.xlu1 %1872 }
 0x361   : > { %v1889_v26 = vadd.f32 %v1873_v50, %v1841_v41 }
 0x363   : > { %1906 = vst.msk [vmem:[%s3112_s4 + $0x78] sm:$0xff] %vm1425_vm15, %v1889_v26 }
 0x364 PF: > { %s16_s20 = sadd.s32 1, %s2251_s20   ;;  %s3120_s18 = smov %s2247_s19 }
 0x365   : > { %p13_p6 = scmp.ge.s32.totalorder %s16_s20, 4   ;;  %s3121_s19 = smov %s3123_s21 }
 0x367   :  { %15 = sbr.rel (!%p13_p6) target bundleno = 2 (0x2), region = 105 }

</bundles_post_ra>
